<compile_context>
chip_gen: v7x
topology: tpu7x:2x2x1
jax: 0.10.0
libtpu: 0.0.40
codegen_flags: <defaults>
</compile_context>

<pallas_src>
from functools import partial

import jax
import jax.numpy as jnp
from jax.experimental import pallas as pl
from jax.experimental.pallas import tpu as pltpu


# ----------------------------- Pallas kernel ------------------------------ #
def mnf_conv_kernel(x_ref, eps_ref, wm_ref, wv_ref, bm_ref, bv_ref, out_ref,
                    *, kH, kW, Ho, Wo, Nb):
    """One grid step == Nb batch images.

    x_ref   : (Nb, C_in, H, W)      NCHW image block
    eps_ref : (Nb, C_out, Ho*Wo)    pre-generated standard-normal noise
    wm_ref  : (C_out, K)            W_mean * z, flattened in (kh, kw, c_in) order
    wv_ref  : (C_out, K)            exp(W_log_var), same flatten order
    bm_ref  : (C_out, 1)            b_mean
    bv_ref  : (C_out, 1)            exp(b_log_var)
    out_ref : (Nb, C_out, Ho*Wo)    mean + sqrt(var) * eps   (NCHW after reshape)
    """
    wm = wm_ref[...]
    wv = wv_ref[...]
    bm = bm_ref[...]
    bv = bv_ref[...]
    P = Ho * Wo

    for b in range(Nb):                               # static, Nb is small (<= 8)
        ximg = x_ref[b]                               # (C_in, H, W)

        # Fused im2col: kH*kW coarse slabs -> (K, Ho*Wo) patch matrix in VMEM.
        # Row order (dh, dw, c_in) matches the flattened weights.
        slabs = []
        for dh in range(kH):
            for dw in range(kW):
                s = ximg[:, dh:dh + Ho, dw:dw + Wo]   # (C_in, Ho, Wo)
                slabs.append(s.reshape(s.shape[0], P))
        rhs = jnp.concatenate(slabs, axis=0)          # (K, Ho*Wo)

        # One MXU dot per image per path. The variance path uses x**2 patches,
        # which are simply the squared x patches.
        mean = jnp.dot(wm, rhs, preferred_element_type=jnp.float32) + bm
        var = jnp.dot(wv, rhs * rhs, preferred_element_type=jnp.float32) + bv
        var = jnp.maximum(var, 0.0)                   # numerical guard before sqrt

        out_ref[b] = mean + jnp.sqrt(var) * eps_ref[b]


def mnf_conv2d_pallas(x, eps, wm, wv, bm, bv, *, kH, kW, images_per_step=8):
    """x: (N, C_in, H, W) f32 NCHW; eps: (N, C_out, Ho*Wo); wm/wv: (C_out, K);
    bm/bv: (C_out, 1).  Returns (N, C_out, Ho*Wo) f32."""
    N, C_in, H, W = x.shape
    C_out, K = wm.shape
    Ho, Wo = H - kH + 1, W - kW + 1
    P = Ho * Wo
    assert K == C_in * kH * kW
    assert eps.shape == (N, C_out, P)

    # Images per grid step: amortize per-step pipeline overhead, but keep >= 2
    # grid steps (when N >= 2) so both v7x TensorCores get work.
    Nb = max(1, min(images_per_step, N))
    while Nb > 1 and pl.cdiv(N, Nb) < 2:
        Nb //= 2
    G = pl.cdiv(N, Nb)
    N_pad = G * Nb
    if N_pad != N:
        x = jnp.pad(x, ((0, N_pad - N), (0, 0), (0, 0), (0, 0)))
        eps = jnp.pad(eps, ((0, N_pad - N), (0, 0), (0, 0)))

    kernel = partial(mnf_conv_kernel, kH=kH, kW=kW, Ho=Ho, Wo=Wo, Nb=Nb)

    grid_spec = pltpu.PrefetchScalarGridSpec(
        num_scalar_prefetch=0,
        grid=(G,),
        in_specs=[
            pl.BlockSpec((Nb, C_in, H, W), lambda g: (g, 0, 0, 0)),   # images
            pl.BlockSpec((Nb, C_out, P), lambda g: (g, 0, 0)),        # eps
            pl.BlockSpec((C_out, K), lambda g: (0, 0)),               # W_mean*z (resident)
            pl.BlockSpec((C_out, K), lambda g: (0, 0)),               # W_var   (resident)
            pl.BlockSpec((C_out, 1), lambda g: (0, 0)),               # b_mean  (resident)
            pl.BlockSpec((C_out, 1), lambda g: (0, 0)),               # b_var   (resident)
        ],
        out_specs=pl.BlockSpec((Nb, C_out, P), lambda g: (g, 0, 0)),
    )
    out = pl.pallas_call(
        kernel,
        out_shape=jax.ShapeDtypeStruct((N_pad, C_out, P), jnp.float32),
        grid_spec=grid_spec,
        compiler_params=pltpu.CompilerParams(
            dimension_semantics=("parallel",),     # batch axis -> both TCs on v7x
            vmem_limit_bytes=32 * 1024 * 1024,     # ample on v5e/v6e/v7x at these block sizes
        ),
    )(x, eps, wm, wv, bm, bv)
    return out[:N]


# ------------------------------ JAX glue ---------------------------------- #
def mlp_apply(layers, x):
    # TODO(synk): torch_mnf's RNVP MLP internals are external to the given module;
    # we use Linear layers with LeakyReLU between hidden layers (no final act).
    for idx, (W, b) in enumerate(layers):
        x = x @ W + b
        if idx < len(layers) - 1:
            x = jax.nn.leaky_relu(x, 0.01)
    return x


def sample_z(params, key):
    """z = q0_mean + exp(q0_log_var/2)*eps, pushed through the RNVP q-flow."""
    q0_std = jnp.sqrt(jnp.exp(params["q0_log_var"]))
    eps_z = jax.random.normal(key, q0_std.shape, dtype=jnp.float32)
    z = params["q0_mean"] + q0_std * eps_z
    for flow in params["flow_q"]:
        z1, z2 = jnp.split(z, 2)
        s = mlp_apply(flow["s"], z2)
        t = mlp_apply(flow["t"], z2)
        z = jnp.concatenate([z1 * jnp.exp(s) + t, z2])  # RNVP affine half flow
    return z


def mnf_conv2d_forward(params, x, key):
    kz, keps = jax.random.split(key)
    z = sample_z(params, kz)

    C_out, C_in, kH, kW = params["W_mean"].shape
    N, _, H, W = x.shape
    Ho, Wo = H - kH + 1, W - kW + 1

    # Flatten weights in (kh, kw, c_in) order to match the kernel's patch order.
    W_mean_scaled = params["W_mean"] * z[:, None, None, None]
    wm = jnp.transpose(W_mean_scaled, (0, 2, 3, 1)).reshape(C_out, -1)
    wv = jnp.transpose(jnp.exp(params["W_log_var"]), (0, 2, 3, 1)).reshape(C_out, -1)
    bm = params["b_mean"].reshape(C_out, 1)
    bv = jnp.exp(params["b_log_var"]).reshape(C_out, 1)

    # eps ~ N(0,1) generated host-side (see TODO at top re on-chip PRNG on real TPU).
    eps = jax.random.normal(keps, (N, C_out, Ho * Wo), dtype=jnp.float32)

    out_flat = mnf_conv2d_pallas(x, eps, wm, wv, bm, bv, kH=kH, kW=kW)
    out = out_flat.reshape(N, C_out, Ho, Wo)          # already NCHW (free reshape)
    return out, (z, eps.reshape(N, C_out, Ho, Wo))


# --------------------------- parameter init -------------------------------- #
def init_mlp(key, sizes):
    layers = []
    ks = jax.random.split(key, len(sizes) - 1)
    for k_, (a, b) in zip(ks, zip(sizes[:-1], sizes[1:])):
        kw, kb = jax.random.split(k_)
        layers.append((0.1 * jax.random.normal(kw, (a, b), dtype=jnp.float32),
                       0.1 * jax.random.normal(kb, (b,), dtype=jnp.float32)))
    return layers


def init_params(key, n_in, n_out, kernel_size, n_flows_q=2, h_sizes=(50,)):
    keys = jax.random.split(key, 8)
    W_shape = (n_out, n_in, kernel_size, kernel_size)
    params = {
        "W_mean": 0.1 * jax.random.normal(keys[0], W_shape, dtype=jnp.float32),
        "W_log_var": -9.0 + 0.1 * jax.random.normal(keys[1], W_shape, dtype=jnp.float32),
        "b_mean": jnp.zeros((n_out,), jnp.float32),
        "b_log_var": -9.0 + 0.1 * jax.random.normal(keys[2], (n_out,), dtype=jnp.float32),
        "q0_mean": 0.1 * jax.random.normal(keys[3], (n_out,), dtype=jnp.float32),
        "q0_log_var": -9.0 + 0.1 * jax.random.normal(keys[4], (n_out,), dtype=jnp.float32),
    }
    d2 = n_out // 2
    sizes = (d2, *h_sizes, d2)
    fk = jax.random.split(keys[5], n_flows_q * 2)
    params["flow_q"] = [
        {"s": init_mlp(fk[2 * i], sizes), "t": init_mlp(fk[2 * i + 1], sizes)}
        for i in range(n_flows_q)
    ]
    return params


# ---------------------------- reference check ------------------------------ #
def reference_forward(params, x, z, eps_nchw):
    """Pure-JAX reference using lax.conv, reusing the same eps passed to the kernel.
    mean = conv(x, W_mean*z) + b_mean ; var = conv(x**2, exp(W_log_var)) + exp(b_log_var)."""
    W_mean = params["W_mean"] * z[:, None, None, None]
    W_var = jnp.exp(params["W_log_var"])
    dn = jax.lax.conv_dimension_numbers(x.shape, W_mean.shape, ("NCHW", "OIHW", "NCHW"))
    mean = jax.lax.conv_general_dilated(x, W_mean, (1, 1), "VALID", dimension_numbers=dn)
    mean = mean + params["b_mean"][None, :, None, None]
    var = jax.lax.conv_general_dilated(x * x, W_var, (1, 1), "VALID", dimension_numbers=dn)
    var = var + jnp.exp(params["b_log_var"])[None, :, None, None]
    return mean + jnp.sqrt(var) * eps_nchw


if __name__ == "__main__":
    n_in, n_out, ksz = 4, 8, 3
    batch, spatial = 2, 16

    root = jax.random.PRNGKey(0)
    k_param, k_x, k_fwd = jax.random.split(root, 3)

    params = init_params(k_param, n_in, n_out, ksz)
    x = jax.random.normal(k_x, (batch, n_in, spatial, spatial), dtype=jnp.float32)

    out, (z, eps) = mnf_conv2d_forward(params, x, k_fwd)
    out = jax.block_until_ready(out)
    Ho = Wo = spatial - ksz + 1
    assert out.shape == (batch, n_out, Ho, Wo)
    assert bool(jnp.all(jnp.isfinite(out)))

    # Exact check of the conv + reparameterization math against lax.conv,
    # reusing the same eps the kernel consumed.
    ref = jax.block_until_ready(reference_forward(params, x, z, eps))
    assert jnp.allclose(out, ref, atol=1e-3, rtol=1e-3), "mismatch vs reference"

    print("KERNEL_OK")
</pallas_src>

<mosaic_0001>
module attributes {stable_mosaic.version = 11 : i64} {
  func.func @mnf_conv_kernel(%arg0: i32, %arg1: memref<1x4x16x16xf32, #tpu.memory_space<vmem>>, %arg2: memref<1x8x196xf32, #tpu.memory_space<vmem>>, %arg3: memref<8x36xf32, #tpu.memory_space<vmem>>, %arg4: memref<8x36xf32, #tpu.memory_space<vmem>>, %arg5: memref<8x1xf32, #tpu.memory_space<vmem>>, %arg6: memref<8x1xf32, #tpu.memory_space<vmem>>, %arg7: memref<1x8x196xf32, #tpu.memory_space<vmem>>) attributes {dimension_semantics = [#tpu.dimension_semantics<parallel>], iteration_bounds = array<i64: 2>, scalar_prefetch = 0 : i64, scratch_operands = 0 : i64, tpu.core_type = #tpu.core_type<tc>, window_params = [{transform_indices = @transform_0, window_bounds = array<i64: 1, 4, 16, 16>}, {transform_indices = @transform_1, window_bounds = array<i64: 1, 8, 196>}, {pipeline_mode = #tpu.pipeline_mode<synchronous>, transform_indices = @transform_2, window_bounds = array<i64: 8, 36>}, {pipeline_mode = #tpu.pipeline_mode<synchronous>, transform_indices = @transform_3, window_bounds = array<i64: 8, 36>}, {pipeline_mode = #tpu.pipeline_mode<synchronous>, transform_indices = @transform_4, window_bounds = array<i64: 8, 1>}, {pipeline_mode = #tpu.pipeline_mode<synchronous>, transform_indices = @transform_5, window_bounds = array<i64: 8, 1>}, {transform_indices = @transform_6, window_bounds = array<i64: 1, 8, 196>}]} {
    %c0 = arith.constant 0 : index
    %c0_0 = arith.constant 0 : index
    %0 = vector.load %arg3[%c0, %c0_0] : memref<8x36xf32, #tpu.memory_space<vmem>>, vector<8x36xf32>
    %c0_1 = arith.constant 0 : index
    %c0_2 = arith.constant 0 : index
    %1 = vector.load %arg4[%c0_1, %c0_2] : memref<8x36xf32, #tpu.memory_space<vmem>>, vector<8x36xf32>
    %c0_3 = arith.constant 0 : index
    %c0_4 = arith.constant 0 : index
    %2 = vector.load %arg5[%c0_3, %c0_4] : memref<8x1xf32, #tpu.memory_space<vmem>>, vector<8x1xf32>
    %c0_5 = arith.constant 0 : index
    %c0_6 = arith.constant 0 : index
    %3 = vector.load %arg6[%c0_5, %c0_6] : memref<8x1xf32, #tpu.memory_space<vmem>>, vector<8x1xf32>
    %c0_7 = arith.constant 0 : index
    %c0_8 = arith.constant 0 : index
    %c0_9 = arith.constant 0 : index
    %c0_10 = arith.constant 0 : index
    %4 = vector.load %arg1[%c0_7, %c0_8, %c0_9, %c0_10] : memref<1x4x16x16xf32, #tpu.memory_space<vmem>>, vector<1x4x16x16xf32>
    %5 = vector.shape_cast %4 : vector<1x4x16x16xf32> to vector<4x16x16xf32>
    %6 = vector.extract_strided_slice %5 {offsets = [0, 0, 0], sizes = [4, 14, 14], strides = [1, 1, 1]} : vector<4x16x16xf32> to vector<4x14x14xf32>
    %7 = vector.shape_cast %6 : vector<4x14x14xf32> to vector<4x196xf32>
    %8 = vector.extract_strided_slice %5 {offsets = [0, 0, 1], sizes = [4, 14, 14], strides = [1, 1, 1]} : vector<4x16x16xf32> to vector<4x14x14xf32>
    %9 = vector.shape_cast %8 : vector<4x14x14xf32> to vector<4x196xf32>
    %10 = vector.extract_strided_slice %5 {offsets = [0, 0, 2], sizes = [4, 14, 14], strides = [1, 1, 1]} : vector<4x16x16xf32> to vector<4x14x14xf32>
    %11 = vector.shape_cast %10 : vector<4x14x14xf32> to vector<4x196xf32>
    %12 = vector.extract_strided_slice %5 {offsets = [0, 1, 0], sizes = [4, 14, 14], strides = [1, 1, 1]} : vector<4x16x16xf32> to vector<4x14x14xf32>
    %13 = vector.shape_cast %12 : vector<4x14x14xf32> to vector<4x196xf32>
    %14 = vector.extract_strided_slice %5 {offsets = [0, 1, 1], sizes = [4, 14, 14], strides = [1, 1, 1]} : vector<4x16x16xf32> to vector<4x14x14xf32>
    %15 = vector.shape_cast %14 : vector<4x14x14xf32> to vector<4x196xf32>
    %16 = vector.extract_strided_slice %5 {offsets = [0, 1, 2], sizes = [4, 14, 14], strides = [1, 1, 1]} : vector<4x16x16xf32> to vector<4x14x14xf32>
    %17 = vector.shape_cast %16 : vector<4x14x14xf32> to vector<4x196xf32>
    %18 = vector.extract_strided_slice %5 {offsets = [0, 2, 0], sizes = [4, 14, 14], strides = [1, 1, 1]} : vector<4x16x16xf32> to vector<4x14x14xf32>
    %19 = vector.shape_cast %18 : vector<4x14x14xf32> to vector<4x196xf32>
    %20 = vector.extract_strided_slice %5 {offsets = [0, 2, 1], sizes = [4, 14, 14], strides = [1, 1, 1]} : vector<4x16x16xf32> to vector<4x14x14xf32>
    %21 = vector.shape_cast %20 : vector<4x14x14xf32> to vector<4x196xf32>
    %22 = vector.extract_strided_slice %5 {offsets = [0, 2, 2], sizes = [4, 14, 14], strides = [1, 1, 1]} : vector<4x16x16xf32> to vector<4x14x14xf32>
    %23 = vector.shape_cast %22 : vector<4x14x14xf32> to vector<4x196xf32>
    %24 = tpu.concatenate %7, %9, %11, %13, %15, %17, %19, %21, %23 in 0 : vector<4x196xf32>, vector<4x196xf32>, vector<4x196xf32>, vector<4x196xf32>, vector<4x196xf32>, vector<4x196xf32>, vector<4x196xf32>, vector<4x196xf32>, vector<4x196xf32> -> vector<36x196xf32>
    %cst = arith.constant dense<0.000000e+00> : vector<8x196xf32>
    %25 = tpu.matmul %0, %24, %cst {dimension_numbers = #tpu.dot_dimension_numbers<[1], [0], [0], [1], [0, 0, 1, 1], [], []>} : vector<8x36xf32>, vector<36x196xf32>, vector<8x196xf32> -> vector<8x196xf32>
    %26 = vector.broadcast %2 : vector<8x1xf32> to vector<8x196xf32>
    %27 = arith.addf %25, %26 : vector<8x196xf32>
    %28 = arith.mulf %24, %24 : vector<36x196xf32>
    %cst_11 = arith.constant dense<0.000000e+00> : vector<8x196xf32>
    %29 = tpu.matmul %1, %28, %cst_11 {dimension_numbers = #tpu.dot_dimension_numbers<[1], [0], [0], [1], [0, 0, 1, 1], [], []>} : vector<8x36xf32>, vector<36x196xf32>, vector<8x196xf32> -> vector<8x196xf32>
    %30 = vector.broadcast %3 : vector<8x1xf32> to vector<8x196xf32>
    %31 = arith.addf %29, %30 : vector<8x196xf32>
    %cst_12 = arith.constant 0.000000e+00 : f32
    %32 = vector.broadcast %cst_12 : f32 to vector<8x196xf32>
    %33 = arith.maximumf %31, %32 : vector<8x196xf32>
    %34 = math.sqrt %33 : vector<8x196xf32>
    %c0_13 = arith.constant 0 : index
    %c0_14 = arith.constant 0 : index
    %c0_15 = arith.constant 0 : index
    %35 = vector.load %arg2[%c0_13, %c0_14, %c0_15] : memref<1x8x196xf32, #tpu.memory_space<vmem>>, vector<1x8x196xf32>
    %36 = vector.shape_cast %35 : vector<1x8x196xf32> to vector<8x196xf32>
    %37 = arith.mulf %34, %36 : vector<8x196xf32>
    %38 = arith.addf %27, %37 : vector<8x196xf32>
    %c0_16 = arith.constant 0 : index
    %c0_17 = arith.constant 0 : index
    %c0_18 = arith.constant 0 : index
    %39 = vector.load %arg7[%c0_16, %c0_17, %c0_18] : memref<1x8x196xf32, #tpu.memory_space<vmem>>, vector<1x8x196xf32>
    %40 = vector.shape_cast %39 : vector<1x8x196xf32> to vector<8x196xf32>
    %41 = vector.shape_cast %38 : vector<8x196xf32> to vector<1x8x196xf32>
    tpu.vector_store %arg7[%c0_16, %c0_17, %c0_18], %41 {strides = array<i32>} : memref<1x8x196xf32, #tpu.memory_space<vmem>>, vector<1x8x196xf32>,
    return
  }
  func.func @transform_0(%arg0: i32) -> (i32, i32, i32, i32) {
    %c0_i32 = arith.constant 0 : i32
    %c0_i32_0 = arith.constant 0 : i32
    %c0_i32_1 = arith.constant 0 : i32
    %c0_i32_2 = arith.constant 0 : i32
    return %arg0, %c0_i32, %c0_i32_0, %c0_i32_1 : i32, i32, i32, i32
  }
  func.func @transform_1(%arg0: i32) -> (i32, i32, i32) {
    %c0_i32 = arith.constant 0 : i32
    %c0_i32_0 = arith.constant 0 : i32
    %c0_i32_1 = arith.constant 0 : i32
    return %arg0, %c0_i32, %c0_i32_0 : i32, i32, i32
  }
  func.func @transform_2(%arg0: i32) -> (i32, i32) {
    %c0_i32 = arith.constant 0 : i32
    %c0_i32_0 = arith.constant 0 : i32
    %c0_i32_1 = arith.constant 0 : i32
    return %c0_i32, %c0_i32_0 : i32, i32
  }
  func.func @transform_3(%arg0: i32) -> (i32, i32) {
    %c0_i32 = arith.constant 0 : i32
    %c0_i32_0 = arith.constant 0 : i32
    %c0_i32_1 = arith.constant 0 : i32
    return %c0_i32, %c0_i32_0 : i32, i32
  }
  func.func @transform_4(%arg0: i32) -> (i32, i32) {
    %c0_i32 = arith.constant 0 : i32
    %c0_i32_0 = arith.constant 0 : i32
    %c0_i32_1 = arith.constant 0 : i32
    return %c0_i32, %c0_i32_0 : i32, i32
  }
  func.func @transform_5(%arg0: i32) -> (i32, i32) {
    %c0_i32 = arith.constant 0 : i32
    %c0_i32_0 = arith.constant 0 : i32
    %c0_i32_1 = arith.constant 0 : i32
    return %c0_i32, %c0_i32_0 : i32, i32
  }
  func.func @transform_6(%arg0: i32) -> (i32, i32, i32) {
    %c0_i32 = arith.constant 0 : i32
    %c0_i32_0 = arith.constant 0 : i32
    %c0_i32_1 = arith.constant 0 : i32
    return %arg0, %c0_i32, %c0_i32_0 : i32, i32, i32
  }
}

</mosaic_0001>

<bundles_post_ra>
// kernel: tpu_custom_call.1
= control target key start
LH: loop header
LB: loop body
LE: loop exit
PB: predicated region body
PF: predicated region fallthrough
CT: control target
= control target key end

     0   :  { %s4338_s0 = inlined_call_operand.hbm [shape: f32[2,4,16,16], index: 0, kind: input, shape index: {}]   ;;  %s4339_s1 = inlined_call_operand.hbm [shape: f32[2,8,196], index: 1, kind: input, shape index: {}]   ;;  %s4340_s2 = inlined_call_operand.vmem [shape: f32[8,36], index: 2, kind: input, shape index: {}]   ;;  %s4341_s3 = inlined_call_operand.vmem [shape: f32[8,36], index: 3, kind: input, shape index: {}]   ;;  %s4342_s4 = inlined_call_operand.vmem [shape: f32[8,1], index: 4, kind: input, shape index: {}]   ;;  %s4343_s5 = inlined_call_operand.vmem [shape: f32[8,1], index: 5, kind: input, shape index: {}]   ;;  %s4344_s6 = inlined_call_operand.hbm [shape: f32[2,8,196], index: 6, kind: output, shape index: {}]  }
   0x1   :  { %4375 = sst [smem:[#allocation34_spill]] %s4338_s0 }
   0x2   :  { %11 = vsyncpa [#allocation3], 0 }
   0x3   :  { %13 = vsyncpa [#allocation3 + $0x1], 0 }
   0x4   :  { %14 = vsyncpa [#allocation6], 0 }
   0x5   :  { %16 = vsyncpa [#allocation6 + $0x1], 0 }
   0x6   :  { %17 = vsyncpa [#allocation4], 0 }
   0x7   :  { %19 = vsyncpa [#allocation4 + $0x1], 0  ;;  %s2912_s21 = smov 0   ;;  %s2914_s22 = smov 0  }
   0x8   :  { %s2916_s23 = smov 0   ;;  %s2918_s24 = smov 0  }
   0x9 LB: > { %s2933_s25 = sadd.s32 4294967295, %s2852_s24   ;;  %s2602_s26 = sadd.s32 4294967294, %s2852_s24   ;;  %s2852_s24 = sphi %s2918_s24, %s4440_s24   ;;  %s2848_s23 = sphi %s2916_s23, %s4439_s23   ;;  %s2844_s22 = sphi %s2914_s22, %s4438_s22   ;;  %s2840_s21 = sphi %s2912_s21, %s4437_s21  }
   0xa   : > { %s2937_s27 = sadd.s32 1, %s2852_s24   ;;  %s32_s28 = sadd.s32 1, %s2848_s23 }
   0xb   : > { %s29_s29 = ssub.s32 %s2852_s24, %s2937_s27  ;;  %p39_p0 = scmp.ne.s32.totalorder %s2848_s23, %s2844_s22 }
   0xc   : > { %p30_p1 = scmp.eq.s32.totalorder %s29_s29, 0  ;;  %p40_p2 = scmp.eq.s32.totalorder %s2852_s24, 0 }
   0xd   : > { %p45_p3 = scmp.ne.s32.totalorder %s2844_s22, %s2840_s21  ;;  %p46_p4 = scmp.eq.s32.totalorder %s2933_s25, 0 }
   0xe   : > { %s2949_s30 = scalar_select %p30_p1, %s2848_s23, %s32_s28  }
   0xf   : > { %p2951_p5 = por %p40_p2, %p39_p0  ;;  %p2955_p6 = por %p46_p4, %p45_p3 }
  0x10   : > { %p179_p7 = scmp.eq.s32.totalorder %s2933_s25, 1  ;;  %p185_p8 = scmp.eq.s32.totalorder %s2602_s26, 1 }
  0x11   : > { %s4377_s8 = scalar_select %p2955_p6, 1, 0 }
  0x12   : > { %p2662_p10 = scmp.lt.s32.totalorder %s2852_s24, 2  ;;  %p2962_p11 = por %p179_p7, %p39_p0 }
  0x13   : > { %p2966_p12 = por %p185_p8, %p45_p3  ;;  %s2971_s11 = sand.u32 1, %s2848_s23  }
  0x14   : > { %s4378_s9 = scalar_select %p2962_p11, 1, 0 }
  0x15   : > { %s4379_s10 = scalar_select %p2966_p12, 1, 0 }
  0x16   : > { %s2626_s12 = sshll.u32 %s2852_s24, 10  ;;  %s2605_s13 = sshll.u32 %s2971_s11, 6 }
  0x17   : > { %s4380_s0 = sld [smem:[#allocation34_spill]]  ;;  %s221_s17 = scalar_lea.vmem [#allocation2], %s2605_s13 }
  0x18   : > { %s228_s18 = sshll.u32 %s221_s17, 4  ;;  %p2982_p13 = pnand %p2662_p10, %p2951_p5  ;;  %s2986_s18 = int_to_ptr.vmem [resolvable:$true] %s228_s18 }
  0x19   : > { %s218_s20 = scalar_lea.sflag [#allocation3], %s2971_s11 }
  0x1a   : > { %p2724_p1 = pneg %p2982_p13 }
  0x1d   : > { %s2978_s16 = scalar_lea.hbm %s4380_s0, %s2626_s12  ;;  %s2727_s7 = scalar_lea.hbm %s4380_s0, 2048 }
  0x1e   : > { %s2722_s26 = scalar_lea.hbm %s2978_s16, 1024  ;;  %p2728_p4 = scmp.lt.u32.totalorder %s2978_s16, %s4380_s0 }
  0x1f   : > { %p2723_p0 = scmp.ne.s32.totalorder %s2978_s16, %s2722_s26  ;;  %p2729_p5 = scmp.lt.u32.totalorder %s2727_s7, %s2722_s26 }
  0x20   : > { %p2731_p8 = scmp.lt.u32.totalorder %s2722_s26, %s2978_s16 }
  0x21   : > { %p2725_p2 = pnand %p2724_p1, %p2723_p0  ;;  %p2730_p7 = por %p2729_p5, %p2728_p4 }
  0x23   : > { %p2726_p3 = pneg %p2725_p2  ;;  %p2732_p10 = por %p2731_p8, %p2730_p7 }
  0x25   : > { %p2733_p9 = pnand %p2732_p10, %p2726_p3 }
  0x27   : > { %2736 = shalt.err (!%p2733_p9)
}
  0x28   : > { %s2737_s14 = scalar_lea.vmem %s2986_s18, 1024  ;;  %s2854_s15 = smov [#allocation2]  }
  0x29   : > { %p2738_p0 = scmp.ne.s32.totalorder %s2986_s18, %s2737_s14  ;;  %s2742_s17 = sshll.u32 %s2854_s15, 4  ;;  %s2743_s17 = int_to_ptr.vmem [resolvable:$false] %s2742_s17 }
  0x2a   : > { %s2744_s28 = scalar_lea.vmem %s2743_s17, 2048  ;;  %p2745_p11 = scmp.lt.s32.totalorder %s2986_s18, %s2743_s17 }
  0x2b   : > { %p2740_p2 = pnand %p2738_p0, %p2724_p1  ;;  %p2746_p4 = scmp.lt.s32.totalorder %s2744_s28, %s2737_s14 }
  0x2d   : > { %p2741_p12 = pneg %p2740_p2  ;;  %p2747_p5 = por %p2746_p4, %p2745_p11 }
  0x2f   : > { %p2748_p7 = pnand %p2747_p5, %p2741_p12 }
  0x31   : > { %2751 = shalt.err (!%p2748_p7)
}
  0x32   : > { %s2855_s26 = smov 128   ;;  %s2856_s29 = smov 8  }
  0x33   : > { %2654 = dma.hbm_to_vmem [thread:$0]  (!%p2982_p13), %s2978_s16, 1024, %s2986_s18, %s218_s20, %s2855_s26, %s2855_s26, %s2856_s29  }
  0x34   : > { %p2611_p9 = scmp.ge.s32.totalorder %s2852_s24, 1  ;;  %p255_p3 = scmp.lt.s32.totalorder %s2852_s24, 3 }
  0x35   : > { %s2608_s7 = sshll.u32 %s2971_s11, 4  ;;  %s2627_s13 = sshll.u32 %s2852_s24, 8 }
  0x36   : > { %p3019_p11 = pnand %p2611_p9, %p255_p3  ;;  %s242_s14 = scalar_lea.vmem [#allocation5], %s2608_s7 }
  0x37   : > { %s250_s15 = sshll.u32 %s242_s14, 4  ;;  %s3027_s0 = scalar_lea.hbm %s4339_s1, %s2627_s13  ;;  %s251_s15 = int_to_ptr.vmem [resolvable:$true] %s250_s15 }
  0x38   : > { %s4382_s12 = scalar_select %p3019_p11, 1, 0 }
  0x39   : > { %s239_s16 = scalar_lea.sflag [#allocation6], %s2971_s11  ;;  %s2752_s18 = scalar_lea.hbm %s3027_s0, 256 }
  0x3a   : > { %p2753_p12 = scmp.ne.s32.totalorder %s3027_s0, %s2752_s18  ;;  %s2757_s29 = scalar_lea.hbm %s4339_s1, 512 }
  0x3b   : > { %p2758_p0 = scmp.lt.u32.totalorder %s3027_s0, %s4339_s1  ;;  %p2759_p2 = scmp.lt.u32.totalorder %s2757_s29, %s2752_s18 }
  0x3c   : > { %p2755_p8 = pnand %p2753_p12, %p2724_p1  ;;  %p2761_p5 = scmp.lt.u32.totalorder %s2752_s18, %s3027_s0 }
  0x3d   : > { %p2760_p4 = por %p2759_p2, %p2758_p0 }
  0x3e   : > { %p2756_p10 = pneg %p2755_p8 }
  0x3f   : > { %p2762_p7 = por %p2761_p5, %p2760_p4 }
  0x41   : > { %p2763_p9 = pnand %p2762_p7, %p2756_p10 }
  0x43   : > { %2766 = shalt.err (!%p2763_p9)
}
  0x44   : > { %s2767_s11 = scalar_lea.vmem %s251_s15, 256  ;;  %s2857_s13 = smov [#allocation5]  }
  0x45   : > { %p2768_p3 = scmp.ne.s32.totalorder %s251_s15, %s2767_s11  ;;  %s2772_s17 = sshll.u32 %s2857_s13, 4  ;;  %s2773_s17 = int_to_ptr.vmem [resolvable:$false] %s2772_s17 }
  0x46   : > { %s2774_s28 = scalar_lea.vmem %s2773_s17, 512  ;;  %p2775_p6 = scmp.lt.s32.totalorder %s251_s15, %s2773_s17 }
  0x47   : > { %p2770_p12 = pnand %p2768_p3, %p2724_p1  ;;  %p2776_p11 = scmp.lt.s32.totalorder %s2774_s28, %s2767_s11 }
  0x49   : > { %p2771_p8 = pneg %p2770_p12  ;;  %p2777_p0 = por %p2776_p11, %p2775_p6 }
  0x4b   : > { %p2778_p2 = pnand %p2777_p0, %p2771_p8 }
  0x4d   : > { %2781 = shalt.err (!%p2778_p2)
}
  0x4e   : > { %2657 = dma.hbm_to_vmem [thread:$0]  (!%p2982_p13), %s3027_s0, 256, %s251_s15, %s239_s16  }
  0x4f   : > { %p4383_p10 = scmp.ne.s32.totalorder %s4382_s12, 0 }
  0x51   : > { %259 = sbr.rel (%p4383_p10) target bundleno = 816 (0x330), region = 44 }
  0x58   : > { %s3052_s18 = sand.u32 1, %s2844_s22   ;;  %p4384_p1 = scmp.ne.s32.totalorder %s4377_s8, 0 }
  0x59   : > { %s2612_s20 = sshll.u32 %s3052_s18, 6  ;;  %s262_s26 = scalar_lea.sflag [#allocation3], %s3052_s18 }
  0x5a   : > { %s265_s29 = scalar_lea.vmem [#allocation2], %s2612_s20 }
  0x5b   : > { %2827 = dma.done.wait (%p4384_p1), %s262_s26, 1024  }
  0x5c   : > { %2829 = vsyncadd (%p4384_p1), %s262_s26, 4294966272  ;;  %s2613_s0 = sshll.u32 %s3052_s18, 4  ;;  %s271_s19 = scalar_lea.sflag [#allocation6], %s3052_s18 }
  0x5d   : > { %s3064_s12 = scalar_lea.vmem [#allocation5], %s2613_s0 }
  0x5e   : > { %2831 = dma.done.wait (%p4384_p1), %s271_s19, 256  }
  0x5f   : > { %2833 = vsyncadd (%p4384_p1), %s271_s19, 4294967040  ;;  %v4347_v0 = vmov 0.0   ;;  %v325_v1 = vlaneseq  ;;  %v2859_v2 = vmov 1983009808   ;;  %v3072_v4 = vld [vmem:[%s265_s29 + $0x20] sm:$0xff]  ;;  %v3076_v6 = vld [vmem:[%s265_s29 + $0x30] sm:$0xff] }
  0x60   : > { %2462 = vmatprep.mubr.f32.mxu1 %v4347_v0  ;;  %2367 = vmatprep.mubr.f32.mxu0 %v4347_v0  ;;  %v323_v3 = vunpack.c.l.s4 %v2859_v2  ;;  %v3074_v5 = vld [vmem:[%s265_s29] sm:$0xff]  ;;  %s2860_s15 = smov 127   ;;  %v314_v7 = vld [vmem:[%s265_s29 + $0x10] sm:$0xff]  ;;  %v3082_v8 = vld [vmem:[%s265_s29 + $0x18] sm:$0xff]  ;;  %vm965_vm0 = vcmask 1046528   ;;  %v975_v10 = vrot.slane %v3076_v6, 1 }
  0x61   : > { %541 = vrot.lane.b32.xlu1 %v3072_v4, %s2860_s15  ;;  %533 = vrot.lane.b32.xlu0 %v3074_v5, %s2860_s15  ;;  %v966_v9 = vrot.slane %v3074_v5, 1  ;;  %v972_v11 = vrot.slane %v3072_v4, 1  ;;  %v3087_v12 = vld [vmem:[%s265_s29 + $0x8] sm:$0xff]  ;;  %v3089_v13 = vld [vmem:[%s265_s29 + $0x38] sm:$0xff]  ;;  %v969_v15 = vrot.slane %v314_v7, 1  ;;  %v3094_v16 = vrot.slane %v3082_v8, 1 }
  0x62   : > { %v3091_v14 = vld [vmem:[%s265_s29 + $0x28] sm:$0xff]  ;;  %v3096_v17 = vshrl.u32 %v325_v1, 7  ;;  %v320_v18 = vcombine.low %v3074_v5, %v3072_v4  ;;  %v3101_v19 = vrot.slane %v3087_v12, 1  ;;  %v324_v20 = vunpack.c.0.s8 %v323_v3  ;;  %s2861_s8 = smov 126   ;;  %s2863_s16 = smov 14  }
  0x63   : > { %v3104_v21 = vrot.slane %v3089_v13, 1  ;;  %v3107_v22 = vrot.slane %v3091_v14, 1  ;;  %v3111_v23 = vsel %vm965_vm0, %v969_v15, %v3094_v16  ;;  %v336_v31 = vcombine.low %v314_v7, %v3076_v6  ;;  %s2864_s7 = smov 28   ;;  %s2865_s14 = smov 42  }
  0x64   : > { %v3118_v24 = vsel %vm965_vm0, %v966_v9, %v3101_v19  ;;  %v3133_v29 = vsub.s32 %v324_v20, %v3096_v17  ;;  %v321_v38 = vcombine.high %v3074_v5, %v3072_v4  ;;  %v337_v39 = vcombine.high %v314_v7, %v3076_v6  ;;  %s2866_s11 = smov 56   ;;  %s2867_s13 = smov 70  }
  0x65   : > { %545 = vrot.lane.b32.xlu1 %v3076_v6, %s2860_s15  ;;  %537 = vrot.lane.b32.xlu0 %v314_v7, %s2860_s15  ;;  %v3122_v25 = vsel %vm965_vm0, %v975_v10, %v3104_v21  ;;  %v3126_v26 = vsel %vm965_vm0, %v972_v11, %v3107_v22  ;;  %v1614_v40 = vrot.slane %v314_v7, 2  ;;  %v3177_v41 = vrot.slane %v3082_v8, 2  ;;  %s2868_s17 = smov 12   ;;  %s2869_s28 = smov 26  }
  0x66   : > { %v1003_v27 = vcombine.high %v3111_v23, %v3122_v25  ;;  %v987_v28 = vcombine.high %v3118_v24, %v3126_v26  ;;  %v3139_v30 = vrot.slane %v320_v18, %v3133_v29  ;;  %v3143_v32 = vrot.slane %v336_v31, %v3133_v29  ;;  %s2870_s20 = smov 84   ;;  %s2871_s26 = smov 40  }
  0x67   : > { %4385 = vst [vmem:[#allocation11_spill] sm:$0xff] %v3177_v41  ;;  %v1611_v42 = vrot.slane %v3074_v5, 2  ;;  %v3181_v43 = vrot.slane %v3087_v12, 2  ;;  %vm1610_vm1 = vcmask 1045504   ;;  %v3184_v44 = vrot.slane %v321_v38, %v3133_v29  ;;  %s2872_s29 = smov 98   ;;  %s2873_s19 = smov 112  }
  0x68   : > { %v3146_v33 = vrot.slane %v987_v28, %v3133_v29  ;;  %v3149_v34 = vrot.slane %v1003_v27, %v3133_v29  ;;  %v352_v35 = vcombine.low %v3139_v30, %v3143_v32  ;;  %v353_v37 = vcombine.high %v3139_v30, %v3143_v32  ;;  %p4434_p13 = scmp.ne.s32.totalorder %s4378_s9, 0 }
  0x69   : > { %753 = vrot.lane.b32.xlu1 %v314_v7, %s2861_s8  ;;  %749 = vrot.lane.b32.xlu0 %v3074_v5, %s2861_s8  ;;  %4386 = vst [vmem:[#allocation12_spill] sm:$0xff] %v3181_v43  ;;  %v3187_v45 = vrot.slane %v337_v39, %v3133_v29  ;;  %v1620_v46 = vrot.slane %v3076_v6, 2  ;;  %v3195_v47 = vrot.slane %v3089_v13, 2  ;;  %v3200_v49 = vsel %vm1610_vm1, %v1614_v40, %v3177_v41 }
  0x6a   : > { %v1034_v36 = vcombine.low %v3146_v33, %v3149_v34  ;;  %v3203_v50 = vsel %vm1610_vm1, %v1611_v42, %v3181_v43  ;;  %v1617_v51 = vrot.slane %v3072_v4, 2  ;;  %v3207_v52 = vrot.slane %v3091_v14, 2 }
  0x6b   : > { %4387 = vst [vmem:[#allocation13_spill] sm:$0xff] %v3195_v47  ;;  %v368_v48 = vcombine.low %v3184_v44, %v3187_v45  ;;  %4388 = vst [vmem:[#allocation14_spill] sm:$0xff] %v3203_v50  ;;  %v3214_v53 = vsel %vm1610_vm1, %v1620_v46, %v3195_v47  ;;  %v1002_v57 = vcombine.low %v3111_v23, %v3122_v25  ;;  %v2862_v59 = vmov 1934713408  }
  0x6c   : > { %4389 = vst [vmem:[#allocation15_spill] sm:$0xff] %v3207_v52  ;;  %v3217_v54 = vsel %vm1610_vm1, %v1617_v51, %v3207_v52  ;;  %v986_v58 = vcombine.low %v3118_v24, %v3126_v26  ;;  %v355_v60 = vunpack.c.l.s4 %v2862_v59  ;;  %v1054_v3 = vcombine.low %v3101_v19, %v3107_v22 }
  0x6d   : > { %761 = vrot.lane.b32.xlu1 %v3076_v6, %s2861_s8  ;;  %757 = vrot.lane.b32.xlu0 %v3072_v4, %s2861_s8  ;;  %4390 = vst [vmem:[#allocation16_spill] sm:$0xff] %v3217_v54  ;;  %v1010_v61 = vrot.slane %v1002_v57, %v3133_v29  ;;  %v1070_v6 = vcombine.low %v3094_v16, %v3104_v21  ;;  %vm499_vm2 = vcmask 113664   ;;  %vm501_vm3 = vcmask 228352  }
  0x6e   : > { %v994_v62 = vrot.slane %v986_v58, %v3133_v29  ;;  %v356_v63 = vunpack.c.0.s8 %v355_v60  ;;  %v1062_v9 = vrot.slane %v1054_v3, %v3133_v29  ;;  %vm503_vm4 = vcmask 343040  }
  0x6f   : > { %v1078_v15 = vrot.slane %v1070_v6, %v3133_v29  ;;  %vm505_vm5 = vcmask 457728   ;;  %vm507_vm6 = vcmask 572416   ;;  %vm517_vm7 = vcmask 97280  }
  0x70   : > { %v3282_v1 = vsub.s32 %v356_v63, %v3096_v17  ;;  %v1018_v2 = vcombine.low %v994_v62, %v1010_v61  ;;  %v1019_v7 = vcombine.high %v994_v62, %v1010_v61  ;;  %vm519_vm8 = vcmask 211968  }
  0x71   : > { %539 = vrot.lane.b32.xlu1 %v3082_v8, %s2860_s15  ;;  %535 = vrot.lane.b32.xlu0 %v3087_v12, %s2860_s15  ;;  %v1086_v20 = vcombine.low %v1062_v9, %v1078_v15  ;;  %v1087_v30 = vcombine.high %v1062_v9, %v1078_v15  ;;  %vm509_vm9 = vcmask 687104   ;;  %vm521_vm10 = vcmask 326656  }
  0x72   : > { %v3291_v4 = vrot.slane %v1018_v2, %v3282_v1  ;;  %v3297_v5 = vrot.slane %v352_v35, %v3282_v1  ;;  %v1033_v17 = vrot.slane %v1019_v7, %v3282_v1  ;;  %v367_v18 = vrot.slane %v353_v37, %v3282_v1 }
  0x73   : > { %v3338_v31 = vrot.slane %v1087_v30, %v3282_v1  ;;  %vm511_vm11 = vcmask 801792   ;;  %vm513_vm12 = vcmask 916480   ;;  %vm515_vm13 = vcmask 1031168  }
  0x74   : > { %4391 = vst [vmem:[#allocation17_spill] sm:$0xff] %v3291_v4  ;;  %4392 = vst [vmem:[#allocation18_spill] sm:$0xff] %v3297_v5  ;;  %v1050_v10 = vcombine.high %v3291_v4, %v4347_v0  ;;  %v384_v11 = vcombine.high %v3297_v5, %v4347_v0  ;;  %vm523_vm14 = vcmask 441344   ;;  %vm2279_vm15 = vcmask 1043456  }
  0x75   : > { %547 = vrot.lane.b32.xlu1 %v3089_v13, %s2860_s15  ;;  %543 = vrot.lane.b32.xlu0 %v3091_v14, %s2860_s15  ;;  %vm2293_vm0 = vcmask 293888  }
  0x79   : > { %1398 = vrot.lane.b32.xlu1 %v3111_v23, %s2861_s8  ;;  %1394 = vrot.lane.b32.xlu0 %v3118_v24, %s2861_s8 }
  0x7d   : > { %1406 = vrot.lane.b32.xlu1 %v3122_v25, %s2861_s8  ;;  %1402 = vrot.lane.b32.xlu0 %v3126_v26, %s2861_s8 }
  0x81   : > { %1827 = vrot.lane.b32.xlu1 %v3200_v49, %s2860_s15  ;;  %1823 = vrot.lane.b32.xlu0 %v3203_v50, %s2860_s15 }
  0x85   : > { %1835 = vrot.lane.b32.xlu1 %v3214_v53, %s2860_s15  ;;  %1831 = vrot.lane.b32.xlu0 %v3217_v54, %s2860_s15 }
  0x89   : > { %755 = vrot.lane.b32.xlu1 %v3082_v8, %s2861_s8  ;;  %751 = vrot.lane.b32.xlu0 %v3087_v12, %s2861_s8 }
  0x8d   : > { %763 = vrot.lane.b32.xlu1 %v3089_v13, %s2861_s8  ;;  %759 = vrot.lane.b32.xlu0 %v3091_v14, %s2861_s8 }
  0x91   : > { %1182 = vrot.lane.b32.xlu1 %v3111_v23, %s2860_s15  ;;  %1178 = vrot.lane.b32.xlu0 %v3118_v24, %s2860_s15  ;;  %v1051_v23 = vcombine.high %v1033_v17, %v4347_v0  ;;  %v385_v24 = vcombine.high %v367_v18, %v4347_v0 }
  0x95   : > { %1190 = vrot.lane.b32.xlu1 %v3122_v25, %s2860_s15  ;;  %1186 = vrot.lane.b32.xlu0 %v3126_v26, %s2860_s15  ;;  %v3323_v25 = vrot.slane %v1086_v20, %v3282_v1  ;;  %v1042_v26 = vrot.slane %v1034_v36, %v3282_v1 }
  0x97   : > { %v1110_v27 = vcombine.high %v3323_v25, %v4347_v0  ;;  %v1052_v28 = vcombine.high %v1042_v26, %v4347_v0 }
  0x99   : > { %1400 = vrot.lane.b32.xlu1 %v3094_v16, %s2861_s8  ;;  %1396 = vrot.lane.b32.xlu0 %v3101_v19, %s2861_s8 }
  0x9d   : > { %1408 = vrot.lane.b32.xlu1 %v3104_v21, %s2861_s8  ;;  %1404 = vrot.lane.b32.xlu0 %v3107_v22, %s2861_s8 }
  0xa1   : > { %1829 = vrot.lane.b32.xlu1 %v3177_v41, %s2860_s15  ;;  %1825 = vrot.lane.b32.xlu0 %v3181_v43, %s2860_s15 }
  0xa5   : > { %1837 = vrot.lane.b32.xlu1 %v3195_v47, %s2860_s15  ;;  %1833 = vrot.lane.b32.xlu0 %v3207_v52, %s2860_s15 }
  0xa9   : > { %1184 = vrot.lane.b32.xlu1 %v3094_v16, %s2860_s15  ;;  %1180 = vrot.lane.b32.xlu0 %v3101_v19, %s2860_s15 }
  0xad   : > { %1192 = vrot.lane.b32.xlu1 %v3104_v21, %s2860_s15  ;;  %1188 = vrot.lane.b32.xlu0 %v3107_v22, %s2860_s15  ;;  %s2874_s15 = smov 54  }
  0xb1   : > { %2043 = vrot.lane.b32.xlu1 %v3200_v49, %s2861_s8  ;;  %2039 = vrot.lane.b32.xlu0 %v3203_v50, %s2861_s8 }
  0xb5   : > { %2051 = vrot.lane.b32.xlu1 %v3214_v53, %s2861_s8  ;;  %2047 = vrot.lane.b32.xlu0 %v3217_v54, %s2861_s8 }
  0xb9   : > { %2045 = vrot.lane.b32.xlu1 %v3177_v41, %s2861_s8  ;;  %2041 = vrot.lane.b32.xlu0 %v3181_v43, %s2861_s8 }
  0xbd   : > { %2053 = vrot.lane.b32.xlu1 %v3195_v47, %s2861_s8  ;;  %2049 = vrot.lane.b32.xlu0 %v3207_v52, %s2861_s8 }
  0xc1   : > { %1114 = vrot.lane.b32.xlu1 %v1050_v10, %s2863_s16  ;;  %448 = vrot.lane.b32.xlu0 %v384_v11, %s2863_s16 }
  0xc5   : > { %1118 = vrot.lane.b32.xlu1 %v1033_v17, %s2864_s7  ;;  %452 = vrot.lane.b32.xlu0 %v367_v18, %s2864_s7 }
  0xc9   : > { %1122 = vrot.lane.b32.xlu1 %v1051_v23, %s2865_s14  ;;  %456 = vrot.lane.b32.xlu0 %v385_v24, %s2865_s14 }
  0xcd   : > { %1126 = vrot.lane.b32.xlu1 %v1042_v26, %s2866_s11  ;;  %1146 = vrot.lane.b32.xlu0 %v1110_v27, %s2861_s8 }
  0xd1   : > { %1130 = vrot.lane.b32.xlu1 %v1052_v28, %s2867_s13 }
  0xd3   : > { %v542_v32 = vpop.permute.xlu1 %541  ;;  %v534_v35 = vpop.permute.xlu0 %533 }
  0xd4   : > { %v557_v36 = vcombine.low %v534_v35, %v542_v32  ;;  %v558_v37 = vcombine.high %v534_v35, %v542_v32 }
  0xd5   : > { %1150 = vrot.lane.b32.xlu1 %v3338_v31, %s2868_s17 }
  0xd6   : > { %v565_v46 = vrot.slane %v557_v36, %v3133_v29  ;;  %v3344_v51 = vrot.slane %v558_v37, %v3133_v29 }
  0xd7   : > { %v546_v38 = vpop.permute.xlu1 %545  ;;  %v538_v39 = vpop.permute.xlu0 %537 }
  0xd8   : > { %v573_v40 = vcombine.low %v538_v39, %v546_v38  ;;  %v574_v42 = vcombine.high %v538_v39, %v546_v38 }
  0xda   : > { %v581_v57 = vrot.slane %v573_v40, %v3133_v29  ;;  %v3348_v58 = vrot.slane %v574_v42, %v3133_v29 }
  0xdb   : > { %v3350_v59 = vpop.permute.xlu1 %753  ;;  %v3352_v60 = vpop.permute.xlu0 %749 }
  0xdc   : > { %v605_v61 = vcombine.low %v3344_v51, %v3348_v58  ;;  %v590_v62 = vcombine.high %v565_v46, %v581_v57  ;;  %v589_v10 = vcombine.low %v565_v46, %v581_v57 }
  0xde   : > { %v613_v63 = vrot.slane %v605_v61, %v3282_v1  ;;  %v604_v2 = vrot.slane %v590_v62, %v3282_v1  ;;  %v3376_v24 = vrot.slane %v589_v10, %v3282_v1 }
  0xdf   : > { %v3358_v3 = vpop.permute.xlu1 %761  ;;  %v3360_v6 = vpop.permute.xlu0 %757 }
  0xe0   : > { %v789_v7 = vcombine.low %v3350_v59, %v3358_v3  ;;  %v773_v9 = vcombine.low %v3352_v60, %v3360_v6  ;;  %697 = vrot.lane.b32.xlu1 %v613_v63, %s2866_s11  ;;  %689 = vrot.lane.b32.xlu0 %v604_v2, %s2864_s7  ;;  %4393 = vst [vmem:[#allocation19_spill] sm:$0xff] %v3376_v24 }
  0xe1   : > { %v621_v37 = vcombine.high %v3376_v24, %v4347_v0  ;;  %v790_v56 = vcombine.high %v3350_v59, %v3358_v3  ;;  %v774_v55 = vcombine.high %v3352_v60, %v3360_v6  ;;  %v4397_v3 = vmov 0.0  }
  0xe2   : > { %v797_v11 = vrot.slane %v789_v7, %v3133_v29  ;;  %v781_v15 = vrot.slane %v773_v9, %v3133_v29 }
  0xe3   : > { %v3370_v17 = vpop.permute.xlu1 %539  ;;  %v3372_v18 = vpop.permute.xlu0 %535  ;;  %v3469_v59 = vrot.slane %v790_v56, %v3133_v29  ;;  %v3472_v60 = vrot.slane %v774_v55, %v3133_v29  ;;  %v404_v56 = vcombine.low %v3082_v8, %v3089_v13 }
  0xe4   : > { %v806_v20 = vcombine.high %v781_v15, %v797_v11  ;;  %v805_v26 = vcombine.low %v781_v15, %v797_v11 }
  0xe5   : > { %v412_v4 = vrot.slane %v404_v56, %v3133_v29 }
  0xe6   : > { %v820_v23 = vrot.slane %v806_v20, %v3282_v1  ;;  %v3396_v40 = vrot.slane %v805_v26, %v3282_v1  ;;  %v622_v26 = vcombine.high %v604_v2, %v4347_v0 }
  0xe7   : > { %v3378_v27 = vpop.permute.xlu1 %547  ;;  %v3380_v28 = vpop.permute.xlu0 %543 }
  0xe8   : > { %v641_v30 = vcombine.low %v3370_v17, %v3378_v27  ;;  %v625_v32 = vcombine.low %v3372_v18, %v3380_v28  ;;  %905 = vrot.lane.b32.xlu0 %v820_v23, %s2864_s7  ;;  %4394 = vst [vmem:[#allocation20_spill] sm:$0xff] %v3396_v40  ;;  %v837_v7 = vcombine.high %v3396_v40, %v4347_v0 }
  0xe9   : > { %v838_v2 = vcombine.high %v820_v23, %v4347_v0 }
  0xea   : > { %v649_v35 = vrot.slane %v641_v30, %v3133_v29  ;;  %v633_v36 = vrot.slane %v625_v32, %v3133_v29 }
  0xeb   : > { %v3391_v38 = vpop.permute.xlu1 %1398  ;;  %v3393_v39 = vpop.permute.xlu0 %1394 }
  0xec   : > { %v657_v42 = vcombine.low %v633_v36, %v649_v35  ;;  %685 = vrot.lane.b32.xlu0 %v621_v37, %s2863_s16  ;;  %v658_v46 = vcombine.high %v633_v36, %v649_v35  ;;  %v623_v37 = vcombine.high %v613_v63, %v4347_v0 }
  0xee   : > { %v672_v57 = vrot.slane %v658_v46, %v3282_v1  ;;  %v3407_v9 = vrot.slane %v657_v42, %v3282_v1 }
  0xef   : > { %v3400_v61 = vpop.permute.xlu1 %1406  ;;  %v3402_v62 = vpop.permute.xlu0 %1402 }
  0xf0   : > { %v1434_v10 = vcombine.low %v3391_v38, %v3400_v61  ;;  %v1418_v11 = vcombine.low %v3393_v39, %v3402_v62  ;;  %721 = vrot.lane.b32.xlu1 %v672_v57, %s2868_s17  ;;  %901 = vrot.lane.b32.xlu0 %v837_v7, %s2863_s16  ;;  %v681_v35 = vcombine.high %v3407_v9, %v4347_v0 }
  0xf2   : > { %v3416_v15 = vrot.slane %v1434_v10, %v3133_v29  ;;  %v1426_v20 = vrot.slane %v1418_v11, %v3133_v29 }
  0xf3   : > { %v3420_v30 = vpop.permute.xlu1 %1827  ;;  %v3422_v32 = vpop.permute.xlu0 %1823 }
  0xf4   : > { %v1450_v36 = vcombine.low %v1426_v20, %v3416_v15  ;;  %693 = vrot.lane.b32.xlu1 %v622_v26, %s2865_s14  ;;  %717 = vrot.lane.b32.xlu0 %v681_v35, %s2861_s8 }
  0xf6   : > { %v3436_v7 = vrot.slane %v1450_v36, %v3282_v1 }
  0xf7   : > { %v3430_v42 = vpop.permute.xlu1 %1835  ;;  %v3432_v46 = vpop.permute.xlu0 %1831 }
  0xf8   : > { %4395 = vst [vmem:[#allocation21_spill] sm:$0xff] %v3436_v7  ;;  %v1863_v10 = vcombine.low %v3420_v30, %v3430_v42  ;;  %v1847_v11 = vcombine.low %v3422_v32, %v3432_v46  ;;  %701 = vrot.lane.b32.xlu1 %v623_v37, %s2867_s13  ;;  %909 = vrot.lane.b32.xlu0 %v838_v2, %s2865_s14 }
  0xf9   : > { %v1482_v23 = vcombine.high %v3436_v7, %v4347_v0  ;;  %v376_v2 = vrot.slane %v368_v48, %v3282_v1  ;;  %v388_v48 = vcombine.low %v3087_v12, %v3091_v14 }
  0xfa   : > { %v1871_v63 = vrot.slane %v1863_v10, %v3133_v29  ;;  %v1855_v26 = vrot.slane %v1847_v11, %v3133_v29 }
  0xfb   : > { %v3448_v35 = vpop.permute.xlu1 %755  ;;  %v3450_v36 = vpop.permute.xlu0 %751 }
  0xfc   : > { %v1879_v37 = vcombine.low %v1855_v26, %v1871_v63  ;;  %1546 = vrot.lane.b32.xlu0 %v1482_v23, %s2863_s16  ;;  %v606_v23 = vcombine.high %v3344_v51, %v3348_v58  ;;  %v821_v51 = vcombine.low %v3472_v60, %v3469_v59  ;;  %v4398_v58 = vcombine.high %v3146_v33, %v3149_v34 }
  0xfd   : > { %v642_v33 = vcombine.high %v3370_v17, %v3378_v27  ;;  %v1111_v34 = vcombine.high %v3338_v31, %v4397_v3  ;;  %v1880_v27 = vcombine.high %v1855_v26, %v1871_v63  ;;  %v386_v31 = vcombine.high %v376_v2, %v4397_v3 }
  0xfe   : > { %v3462_v10 = vrot.slane %v1879_v37, %v3282_v1  ;;  %v682_v37 = vcombine.high %v672_v57, %v4397_v3  ;;  %v620_v40 = vrot.slane %v606_v23, %v3282_v1  ;;  %v396_v57 = vrot.slane %v388_v48, %v3133_v29 }
  0xff   : > { %v3464_v11 = vpop.permute.xlu1 %763  ;;  %v3466_v0 = vpop.permute.xlu0 %759  ;;  %v1451_v23 = vcombine.high %v1426_v20, %v3416_v15  ;;  %v626_v15 = vcombine.high %v3372_v18, %v3380_v28 }
 0x100   : > { %4396 = vst [vmem:[#allocation22_spill] sm:$0xff] %v3462_v10  ;;  %v1911_v6 = vcombine.high %v3462_v10, %v4397_v3  ;;  %460 = vrot.lane.b32.xlu0 %v376_v2, %s2866_s11  ;;  %v420_v48 = vcombine.low %v396_v57, %v412_v4  ;;  %v857_v20 = vcombine.low %v3448_v35, %v3464_v11 }
 0x101   : > { %v3520_v56 = vrot.slane %v1451_v23, %v3282_v1  ;;  %v421_v18 = vcombine.high %v396_v57, %v412_v4  ;;  %v656_v23 = vrot.slane %v642_v33, %v3133_v29  ;;  %v640_v5 = vrot.slane %v626_v15, %v3133_v29 }
 0x102   : > { %1975 = vrot.lane.b32.xlu1 %v1911_v6, %s2863_s16  ;;  %v3497_v6 = vrot.slane %v4398_v58, %v3282_v1  ;;  %v3533_v28 = vrot.slane %v420_v48, %v3282_v1  ;;  %v865_v41 = vrot.slane %v857_v20, %v3133_v29  ;;  %v1894_v2 = vrot.slane %v1880_v27, %v3282_v1 }
 0x103   : > { %v3485_v55 = vpop.permute.xlu1 %1182  ;;  %v3487_v7 = vpop.permute.xlu0 %1178  ;;  %v3546_v4 = vrot.slane %v421_v18, %v3282_v1  ;;  %v673_v15 = vcombine.low %v640_v5, %v656_v23  ;;  %v1647_v27 = vcombine.low %v3200_v49, %v3214_v53  ;;  %v1055_v18 = vcombine.high %v3101_v19, %v3107_v22 }
 0x104   : > { %725 = vrot.lane.b32.xlu0 %v682_v37, %s2869_s28  ;;  %v829_v37 = vrot.slane %v821_v51, %v3282_v1  ;;  %v841_v51 = vcombine.low %v3450_v36, %v3466_v0  ;;  %v444_v57 = vcombine.high %v3533_v28, %v4397_v3  ;;  %v1071_v5 = vcombine.high %v3094_v16, %v3104_v21 }
 0x105   : > { %v680_v52 = vrot.slane %v673_v15, %v3282_v1  ;;  %v624_v19 = vcombine.high %v620_v40, %v4397_v3  ;;  %v3586_v22 = vrot.slane %v1647_v27, %v3133_v29  ;;  %v1069_v21 = vrot.slane %v1055_v18, %v3133_v29 }
 0x106   : > { %705 = vrot.lane.b32.xlu1 %v620_v40, %s2870_s20  ;;  %v849_v47 = vrot.slane %v841_v51, %v3133_v29  ;;  %v839_v27 = vcombine.high %v829_v37, %v4397_v3  ;;  %v1053_v18 = vcombine.high %v3497_v6, %v4397_v3 }
 0x107   : > { %v3503_v10 = vpop.permute.xlu1 %1190  ;;  %v3505_v24 = vpop.permute.xlu0 %1186 }
 0x108   : > { %1134 = vrot.lane.b32.xlu0 %v3497_v6, %s2870_s20  ;;  %v1218_v33 = vcombine.low %v3485_v55, %v3503_v10  ;;  %v1202_v48 = vcombine.low %v3487_v7, %v3505_v24 }
 0x10a   : > { %913 = vrot.lane.b32.xlu1 %v829_v37, %s2866_s11  ;;  %v3571_v23 = vrot.slane %v1218_v33, %v3133_v29  ;;  %v3574_v43 = vrot.slane %v1202_v48, %v3133_v29  ;;  %v1085_v33 = vrot.slane %v1071_v5, %v3133_v29 }
 0x10b   : > { %v3524_v58 = vpop.permute.xlu1 %1400  ;;  %v3526_v17 = vpop.permute.xlu0 %1396 }
 0x10c   : > { %1550 = vrot.lane.b32.xlu0 %v3520_v56, %s2864_s7 }
 0x10e   : > { %1154 = vrot.lane.b32.xlu1 %v1111_v34, %s2869_s28  ;;  %v873_v34 = vcombine.low %v849_v47, %v865_v41 }
 0x10f   : > { %v3539_v63 = vpop.permute.xlu1 %1408  ;;  %v3541_v26 = vpop.permute.xlu0 %1404 }
 0x110   : > { %464 = vrot.lane.b32.xlu0 %v386_v31, %s2867_s13  ;;  %v1631_v31 = vcombine.low %v3203_v50, %v3217_v54  ;;  %v3578_v50 = vrot.slane %v873_v34, %v3282_v1  ;;  %v1234_v34 = vcombine.low %v3574_v43, %v3571_v23 }
 0x112   : > { %1979 = vrot.lane.b32.xlu1 %v1894_v2, %s2864_s7  ;;  %4399 = vst [vmem:[#allocation23_spill] sm:$0xff] %v3578_v50  ;;  %v3589_v16 = vrot.slane %v1631_v31, %v3133_v29  ;;  %v897_v40 = vcombine.high %v3578_v50, %v4397_v3  ;;  %v874_v31 = vcombine.high %v849_v47, %v865_v41 }
 0x113   : > { %v3555_v20 = vpop.permute.xlu1 %1829  ;;  %v3557_v51 = vpop.permute.xlu0 %1825  ;;  %v3611_v50 = vrot.slane %v1234_v34, %v3282_v1 }
 0x114   : > { %484 = vrot.lane.b32.xlu0 %v3546_v4, %s2868_s17  ;;  %v1663_v5 = vcombine.low %v3589_v16, %v3586_v22 }
 0x115   : > { %4402 = vst [vmem:[#allocation26_spill] sm:$0xff] %v3611_v50  ;;  %v1266_v6 = vcombine.high %v3611_v50, %v4397_v3 }
 0x116   : > { %480 = vrot.lane.b32.xlu1 %v444_v57, %s2861_s8  ;;  %v3620_v41 = vrot.slane %v1663_v5, %v3282_v1  ;;  %v1912_v5 = vcombine.high %v1894_v2, %v4397_v3  ;;  %v1435_v2 = vcombine.high %v3391_v38, %v3400_v61  ;;  %v1235_v38 = vcombine.high %v3574_v43, %v3571_v23 }
 0x117   : > { %v3580_v54 = vpop.permute.xlu1 %1837  ;;  %v3582_v57 = vpop.permute.xlu0 %1833 }
 0x118   : > { %729 = vrot.lane.b32.xlu0 %v680_v52, %s2871_s26  ;;  %4403 = vst [vmem:[#allocation27_spill] sm:$0xff] %v3620_v41 }
 0x11a   : > { %709 = vrot.lane.b32.xlu1 %v624_v19, %s2872_s29  ;;  %v1102_v19 = vcombine.low %v1069_v21, %v1085_v33  ;;  %v1695_v33 = vcombine.high %v3620_v41, %v4397_v3  ;;  %v4419_v41 = vld [vmem:[#allocation11_spill] sm:$0xff] }
 0x11b   : > { %v3599_v48 = vpop.permute.xlu1 %1184  ;;  %v3601_v15 = vpop.permute.xlu0 %1180 }
 0x11c   : > { %4400 = vst [vmem:[#allocation24_spill] sm:$0xff] %v3599_v48  ;;  %4401 = vst [vmem:[#allocation25_spill] sm:$0xff] %v3601_v15  ;;  %933 = vrot.lane.b32.xlu0 %v897_v40, %s2861_s8  ;;  %v888_v15 = vrot.slane %v874_v31, %v3282_v1  ;;  %v1109_v47 = vrot.slane %v1102_v19, %v3282_v1  ;;  %v1483_v40 = vcombine.high %v3520_v56, %v4397_v3 }
 0x11d   : > { %v445_v56 = vcombine.high %v3546_v4, %v4397_v3  ;;  %v1419_v4 = vcombine.high %v3393_v39, %v3402_v62  ;;  %v1864_v39 = vcombine.high %v3420_v30, %v3430_v42  ;;  %v389_v30 = vcombine.high %v3087_v12, %v3091_v14 }
 0x11e   : > { %917 = vrot.lane.b32.xlu1 %v839_v27, %s2867_s13  ;;  %v4404_v27 = vcombine.high %v3184_v44, %v3187_v45  ;;  %v898_v62 = vcombine.high %v888_v15, %v4397_v3  ;;  %v1112_v43 = vcombine.high %v1109_v47, %v4397_v3  ;;  %v1249_v42 = vrot.slane %v1235_v38, %v3282_v1 }
 0x11f   : > { %v3613_v48 = vpop.permute.xlu1 %1192  ;;  %v3616_v37 = vpop.permute.xlu0 %1188  ;;  %v3676_v61 = vrot.slane %v1419_v4, %v3133_v29 }
 0x120   : > { %1138 = vrot.lane.b32.xlu0 %v1053_v18, %s2872_s29  ;;  %v383_v31 = vrot.slane %v4404_v27, %v3282_v1  ;;  %v1664_v27 = vcombine.high %v3589_v16, %v3586_v22  ;;  %v1502_v16 = vcombine.low %v3524_v58, %v3539_v63 }
 0x122   : > { %937 = vrot.lane.b32.xlu1 %v888_v15, %s2868_s17  ;;  %v1678_v12 = vrot.slane %v1664_v27, %v3282_v1  ;;  %v1486_v15 = vcombine.low %v3526_v17, %v3541_v26  ;;  %v1510_v38 = vrot.slane %v1502_v16, %v3133_v29  ;;  %v1915_v27 = vcombine.low %v3557_v51, %v3582_v57 }
 0x123   : > { %v3626_v21 = vpop.permute.xlu1 %2043  ;;  %v3632_v34 = vpop.permute.xlu0 %2039  ;;  %v1267_v16 = vcombine.high %v1249_v42, %v4397_v3 }
 0x124   : > { %1330 = vrot.lane.b32.xlu0 %v1266_v6, %s2863_s16  ;;  %v822_v6 = vcombine.high %v3472_v60, %v3469_v59  ;;  %v683_v59 = vcombine.high %v680_v52, %v4397_v3  ;;  %v1848_v52 = vcombine.high %v3422_v32, %v3432_v46  ;;  %v405_v32 = vcombine.high %v3082_v8, %v3089_v13 }
 0x125   : > { %v403_v13 = vrot.slane %v389_v30, %v3133_v29 }
 0x126   : > { %1158 = vrot.lane.b32.xlu1 %v1109_v47, %s2871_s26  ;;  %v3702_v23 = vrot.slane %v1848_v52, %v3133_v29  ;;  %v419_v14 = vrot.slane %v405_v32, %v3133_v29  ;;  %v1931_v52 = vcombine.low %v3555_v20, %v3580_v54 }
 0x127   : > { %v3642_v18 = vpop.permute.xlu1 %2051  ;;  %v3645_v19 = vpop.permute.xlu0 %2047 }
 0x128   : > { %1759 = vrot.lane.b32.xlu0 %v1695_v33, %s2863_s16  ;;  %v836_v33 = vrot.slane %v822_v6, %v3282_v1 }
 0x12a   : > { %1554 = vrot.lane.b32.xlu1 %v1483_v40, %s2865_s14 }
 0x12b   : > { %v3653_v44 = vpop.permute.xlu1 %2045  ;;  %v3658_v45 = vpop.permute.xlu0 %2041 }
 0x12c   : > { %468 = vrot.lane.b32.xlu0 %v383_v31, %s2870_s20  ;;  %4405 = vst [vmem:[#allocation28_spill] sm:$0xff] %v3653_v44  ;;  %4406 = vst [vmem:[#allocation29_spill] sm:$0xff] %v3658_v45 }
 0x12e   : > { %1983 = vrot.lane.b32.xlu1 %v1912_v5, %s2865_s14  ;;  %v858_v5 = vcombine.high %v3448_v35, %v3464_v11 }
 0x12f   : > { %v3667_v60 = vpop.permute.xlu1 %2053  ;;  %v3683_v40 = vpop.permute.xlu0 %2049 }
 0x130   : > { %713 = vrot.lane.b32.xlu0 %v3407_v9, %s2873_s19  ;;  %4407 = vst [vmem:[#allocation30_spill] sm:$0xff] %v3667_v60  ;;  %v3671_v9 = vrot.slane %v1435_v2, %v3133_v29  ;;  %4408 = vst [vmem:[#allocation31_spill] sm:$0xff] %v3683_v40  ;;  %v387_v2 = vcombine.high %v383_v31, %v4397_v3  ;;  %v872_v35 = vrot.slane %v858_v5, %v3133_v29 }
 0x132   : > { %488 = vrot.lane.b32.xlu1 %v445_v56, %s2869_s28  ;;  %v1466_v46 = vcombine.low %v3676_v61, %v3671_v9  ;;  %v842_v56 = vcombine.high %v3450_v36, %v3466_v0 }
 0x133   : > { %v3704_v22 = vpop.permute.xlu1 %1114  ;;  %v3709_v8 = vpop.permute.xlu0 %448 }
 0x134   : > { %921 = vrot.lane.b32.xlu0 %v836_v33, %s2870_s20  ;;  %v1474_v6 = vrot.slane %v1466_v46, %v3282_v1  ;;  %v856_v11 = vrot.slane %v842_v56, %v3133_v29 }
 0x136   : > { %733 = vrot.lane.b32.xlu1 %v683_v59, %s2874_s15  ;;  %v436_v59 = vcombine.low %v403_v13, %v419_v14  ;;  %v889_v30 = vcombine.low %v856_v11, %v872_v35  ;;  %v1939_v13 = vrot.slane %v1931_v52, %v3133_v29  ;;  %v1923_v14 = vrot.slane %v1915_v27, %v3133_v29 }
 0x137   : > { %v3726_v4 = vpop.permute.xlu1 %1118  ;;  %v3734_v36 = vpop.permute.xlu0 %452  ;;  %v1696_v35 = vcombine.high %v1678_v12, %v4397_v3 }
 0x138   : > { %1142 = vrot.lane.b32.xlu0 %v3323_v25, %s2873_s19  ;;  %v3699_v25 = vrot.slane %v1864_v39, %v3133_v29  ;;  %v1494_v39 = vrot.slane %v1486_v15, %v3133_v29  ;;  %v443_v31 = vrot.slane %v436_v59, %v3282_v1  ;;  %v1947_v5 = vcombine.low %v1923_v14, %v1939_v13 }
 0x139   : > { %v1948_v27 = vcombine.high %v1923_v14, %v1939_v13 }
 0x13a   : > { %941 = vrot.lane.b32.xlu1 %v898_v62, %s2869_s28  ;;  %v1895_v47 = vcombine.low %v3702_v23, %v3699_v25  ;;  %v1518_v62 = vcombine.low %v1494_v39, %v1510_v38  ;;  %v3770_v11 = vrot.slane %v1947_v5, %v3282_v1 }
 0x13b   : > { %v3744_v32 = vpop.permute.xlu1 %1122  ;;  %v3748_v46 = vpop.permute.xlu0 %456 }
 0x13c   : > { %1334 = vrot.lane.b32.xlu0 %v1249_v42, %s2864_s7  ;;  %v1903_v0 = vrot.slane %v1895_v47, %v3282_v1  ;;  %v3754_v15 = vrot.slane %v1518_v62, %v3282_v1  ;;  %v1484_v42 = vcombine.high %v1474_v6, %v4397_v3 }
 0x13e   : > { %1162 = vrot.lane.b32.xlu1 %v1112_v43, %s2874_s15  ;;  %v840_v43 = vcombine.high %v836_v33, %v4397_v3  ;;  %v896_v33 = vrot.slane %v889_v30, %v3282_v1  ;;  %v1542_v56 = vcombine.high %v3754_v15, %v4397_v3 }
 0x13f   : > { %v3758_v47 = vpop.permute.xlu1 %1126  ;;  %v3763_v59 = vpop.permute.xlu0 %1146 }
 0x140   : > { %1763 = vrot.lane.b32.xlu0 %v1678_v12, %s2864_s7  ;;  %4409 = vst [vmem:[#allocation32_spill] sm:$0xff] %v3763_v59  ;;  %v1203_v12 = vcombine.high %v3487_v7, %v3505_v24  ;;  %v1962_v24 = vrot.slane %v1948_v27, %v3282_v1  ;;  %v1648_v7 = vcombine.high %v3200_v49, %v3214_v53  ;;  %v4415_v27 = vld [vmem:[#allocation25_spill] sm:$0xff] }
 0x142   : > { %1558 = vrot.lane.b32.xlu1 %v1474_v6, %s2866_s11  ;;  %v1219_v6 = vcombine.high %v3485_v55, %v3503_v10  ;;  %v3796_v10 = vrot.slane %v1203_v12, %v3133_v29  ;;  %v4411_v55 = vld [vmem:[#allocation16_spill] sm:$0xff] }
 0x143   : > { %v3772_v52 = vpop.permute.xlu1 %1130  ;;  %v4414_v12 = vld [vmem:[#allocation24_spill] sm:$0xff] }
 0x144   : > { %472 = vrot.lane.b32.xlu0 %v387_v2, %s2872_s29  ;;  %v1519_v2 = vcombine.high %v1494_v39, %v1510_v38  ;;  %v1971_v39 = vcombine.high %v3770_v11, %v4397_v3  ;;  %v3793_v5 = vrot.slane %v1219_v6, %v3133_v29  ;;  %v1467_v6 = vcombine.high %v3676_v61, %v3671_v9 }
 0x145   : > { %v1896_v9 = vcombine.high %v3702_v23, %v3699_v25  ;;  %v1503_v23 = vcombine.high %v3524_v58, %v3539_v63 }
 0x146   : > { %1987 = vrot.lane.b32.xlu1 %v1903_v0, %s2866_s11  ;;  %v1533_v62 = vrot.slane %v1519_v2, %v3282_v1  ;;  %v1250_v2 = vcombine.low %v3796_v10, %v3793_v5 }
 0x147   : > { %v3787_v30 = vpop.permute.xlu1 %1150 }
 0x148   : > { %925 = vrot.lane.b32.xlu0 %v840_v43, %s2872_s29  ;;  %v1913_v43 = vcombine.high %v1903_v0, %v4397_v3  ;;  %4410 = vst [vmem:[#allocation33_spill] sm:$0xff] %v3787_v30  ;;  %v4412_v0 = vld [vmem:[#allocation14_spill] sm:$0xff]  ;;  %v4418_v30 = vld [vmem:[#allocation13_spill] sm:$0xff] }
 0x149   : > { %v1632_v13 = vcombine.high %v4412_v0, %v4411_v55  ;;  %v899_v55 = vcombine.high %v896_v33, %v4397_v3  ;;  %v1715_v50 = vcombine.low %v4419_v41, %v4418_v30 }
 0x14a   : > { %492 = vrot.lane.b32.xlu1 %v443_v31, %s2871_s26 }
 0x14b   : > { %v3819_v49 = vrot.slane %v1632_v13, %v3133_v29  ;;  %v1543_v13 = vcombine.high %v1533_v62, %v4397_v3  ;;  %v1723_v40 = vrot.slane %v1715_v50, %v3133_v29 }
 0x14c   : > { %1338 = vrot.lane.b32.xlu0 %v1267_v16, %s2865_s14 }
 0x14e   : > { %945 = vrot.lane.b32.xlu1 %v896_v33, %s2871_s26  ;;  %v1481_v33 = vrot.slane %v1467_v6, %v3282_v1 }
 0x150   : > { %1578 = vrot.lane.b32.xlu0 %v1542_v56, %s2861_s8  ;;  %v446_v56 = vcombine.high %v443_v31, %v4397_v3  ;;  %v1258_v31 = vrot.slane %v1250_v2, %v3282_v1 }
 0x152   : > { %1562 = vrot.lane.b32.xlu1 %v1484_v42, %s2867_s13  ;;  %v3776_v38 = vpop.permute.xlu0 %689  ;;  %v3811_v42 = vpop.permute.xlu1 %697 }
 0x154   : > { %1767 = vrot.lane.b32.xlu0 %v1696_v35, %s2865_s14  ;;  %v4413_v35 = vld [vmem:[#allocation23_spill] sm:$0xff] }
 0x156   : > { %1582 = vrot.lane.b32.xlu1 %v1533_v62, %s2868_s17  ;;  %v1487_v62 = vcombine.high %v3526_v17, %v3541_v26  ;;  %v1268_v17 = vcombine.high %v1258_v31, %v4397_v3 }
 0x158   : > { %2007 = vrot.lane.b32.xlu0 %v1971_v39, %s2861_s8  ;;  %v1286_v39 = vcombine.low %v4414_v12, %v3613_v48  ;;  %v1501_v58 = vrot.slane %v1487_v62, %v3133_v29 }
 0x15a   : > { %1991 = vrot.lane.b32.xlu1 %v1913_v43, %s2867_s13  ;;  %v3790_v16 = vpop.permute.xlu0 %905  ;;  %v1270_v43 = vcombine.low %v4415_v27, %v3616_v37 }
 0x15c   : > { %476 = vrot.lane.b32.xlu0 %v3533_v28, %s2873_s19  ;;  %v3816_v28 = vrot.slane %v1648_v7, %v3133_v29  ;;  %v1278_v2 = vrot.slane %v1270_v43, %v3133_v29 }
 0x15e   : > { %2011 = vrot.lane.b32.xlu1 %v1962_v24, %s2868_s17  ;;  %v3806_v14 = vpop.permute.xlu0 %685  ;;  %v1679_v0 = vcombine.low %v3819_v49, %v3816_v28 }
 0x160   : > { %929 = vrot.lane.b32.xlu0 %v4413_v35, %s2873_s19  ;;  %v4416_v35 = vld [vmem:[#allocation15_spill] sm:$0xff]  ;;  %v1687_v25 = vrot.slane %v1679_v0, %v3282_v1  ;;  %v1517_v0 = vrot.slane %v1503_v23, %v3133_v29 }
 0x162   : > { %496 = vrot.lane.b32.xlu1 %v446_v56, %s2874_s15  ;;  %v3822_v53 = vpop.permute.xlu0 %901  ;;  %v3831_v7 = vpop.permute.xlu1 %721  ;;  %v1294_v56 = vrot.slane %v1286_v39, %v3133_v29  ;;  %v1910_v39 = vrot.slane %v1896_v9, %v3282_v1  ;;  %v1972_v9 = vcombine.high %v1962_v24, %v4397_v3 }
 0x164   : > { %1342 = vrot.lane.b32.xlu0 %v1258_v31, %s2866_s11  ;;  %v1302_v43 = vcombine.low %v1278_v2, %v1294_v56  ;;  %v1303_v63 = vcombine.high %v1278_v2, %v1294_v56 }
 0x166   : > { %949 = vrot.lane.b32.xlu1 %v899_v55, %s2874_s15  ;;  %v3840_v61 = vpop.permute.xlu0 %717  ;;  %v4417_v55 = vld [vmem:[#allocation12_spill] sm:$0xff]  ;;  %v3851_v45 = vpop.permute.xlu1 %693  ;;  %v3875_v60 = vrot.slane %v1302_v43, %v3282_v1  ;;  %v1317_v56 = vrot.slane %v1303_v63, %v3282_v1 }
 0x167   : > { %v1699_v59 = vcombine.low %v4417_v55, %v4416_v35 }
 0x168   : > { %1586 = vrot.lane.b32.xlu0 %v1543_v13, %s2869_s28  ;;  %v1326_v31 = vcombine.high %v3875_v60, %v4397_v3 }
 0x169   : > { %v1707_v13 = vrot.slane %v1699_v59, %v3133_v29  ;;  %v1534_v59 = vcombine.low %v1501_v58, %v1517_v0  ;;  %v1932_v0 = vcombine.high %v3555_v20, %v3580_v54  ;;  %v1916_v58 = vcombine.high %v3557_v51, %v3582_v57  ;;  %v4420_v51 = vld [vmem:[#allocation18_spill] sm:$0xff] }
 0x16a   : > { %1566 = vrot.lane.b32.xlu1 %v1481_v33, %s2870_s20  ;;  %v3859_v6 = vpop.permute.xlu0 %909  ;;  %v3871_v26 = vpop.permute.xlu1 %701  ;;  %v500_v57 = vsel %vm499_vm2, %v4420_v51, %v3709_v8 }
 0x16b   : > { %v1731_v50 = vcombine.low %v1707_v13, %v1723_v40  ;;  %v1541_v43 = vrot.slane %v1534_v59, %v3282_v1  ;;  %v1732_v59 = vcombine.high %v1707_v13, %v1723_v40  ;;  %v1946_v54 = vrot.slane %v1932_v0, %v3133_v29 }
 0x16c   : > { %1995 = vrot.lane.b32.xlu0 %v1910_v39, %s2870_s20  ;;  %v1930_v20 = vrot.slane %v1916_v58, %v3133_v29  ;;  %v1251_v40 = vcombine.high %v3796_v10, %v3793_v5  ;;  %v502_v13 = vsel %vm501_vm3, %v500_v57, %v3734_v36  ;;  %v1914_v58 = vcombine.high %v1910_v39, %v4397_v3  ;;  %v4421_v5 = vld [vmem:[#allocation19_spill] sm:$0xff] }
 0x16d   : > { %v3884_v24 = vrot.slane %v1731_v50, %v3282_v1  ;;  %v1697_v50 = vcombine.high %v1687_v25, %v4397_v3  ;;  %v736_v36 = vsel %vm499_vm2, %v4421_v5, %v3806_v14  ;;  %v1680_v14 = vcombine.high %v3819_v49, %v3816_v28 }
 0x16e   : > { %1771 = vrot.lane.b32.xlu1 %v1687_v25, %s2866_s11  ;;  %v3868_v44 = vpop.permute.xlu0 %1546  ;;  %v1746_v25 = vrot.slane %v1732_v59, %v3282_v1  ;;  %v1963_v8 = vcombine.low %v1930_v20, %v1946_v54  ;;  %v1265_v39 = vrot.slane %v1251_v40, %v3282_v1  ;;  %v4422_v59 = vld [vmem:[#allocation22_spill] sm:$0xff]  ;;  %v1327_v28 = vcombine.high %v1317_v56, %v4397_v3 }
 0x170   : > { %1346 = vrot.lane.b32.xlu0 %v1268_v17, %s2867_s13  ;;  %v1485_v17 = vcombine.high %v1481_v33, %v4397_v3 }
 0x172   : > { %2015 = vrot.lane.b32.xlu1 %v1972_v9, %s2869_s28  ;;  %v461_v23 = vpop.permute.xlu0 %460  ;;  %v1755_v9 = vcombine.high %v3884_v24, %v4397_v3 }
 0x174   : > { %v1976_v2 = vpop.permute.xlu1 %1975  ;;  %1366 = vrot.lane.b32.xlu0 %v1317_v56, %s2868_s17  ;;  %v1544_v56 = vcombine.high %v1541_v43, %v4397_v3 }
 0x175   : > { %v2026_v54 = vsel %vm499_vm2, %v4422_v59, %v1976_v2  ;;  %v737_v2 = vsel %vm501_vm3, %v736_v36, %v3776_v38 }
 0x176   : > { %1362 = vrot.lane.b32.xlu1 %v1326_v31, %s2861_s8  ;;  %v3887_v62 = vpop.permute.xlu0 %725 }
 0x178   : > { %v3894_v63 = vpop.permute.xlu1 %705  ;;  %1590 = vrot.lane.b32.xlu0 %v1541_v43, %s2871_s26 }
 0x17a   : > { %1570 = vrot.lane.b32.xlu1 %v1485_v17, %s2872_s29  ;;  %v3902_v31 = vpop.permute.xlu0 %1134 }
 0x17c   : > { %v3909_v33 = vpop.permute.xlu1 %913  ;;  %1791 = vrot.lane.b32.xlu0 %v1755_v9, %s2861_s8  ;;  %v504_v9 = vsel %vm503_vm4, %v502_v13, %v3748_v46  ;;  %v1970_v46 = vrot.slane %v1963_v8, %v3282_v1  ;;  %v738_v13 = vsel %vm503_vm4, %v737_v2, %v3851_v45  ;;  %v745_v45 = vsel %vm517_vm7, %v3840_v61, %v3831_v7 }
 0x17d   : > { %v506_v10 = vsel %vm505_vm5, %v504_v9, %v461_v23  ;;  %v4423_v23 = vld [vmem:[#allocation17_spill] sm:$0xff]  ;;  %v739_v38 = vsel %vm505_vm5, %v738_v13, %v3811_v42  ;;  %v746_v7 = vsel %vm519_vm8, %v745_v45, %v3887_v62  ;;  %v1271_v42 = vcombine.high %v4415_v27, %v3616_v37 }
 0x17e   : > { %1775 = vrot.lane.b32.xlu1 %v1697_v50, %s2867_s13  ;;  %v3918_v0 = vpop.permute.xlu0 %1550  ;;  %v1165_v40 = vsel %vm499_vm2, %v4423_v23, %v3704_v22  ;;  %v1694_v22 = vrot.slane %v1680_v14, %v3282_v1  ;;  %v740_v5 = vsel %vm507_vm6, %v739_v38, %v3871_v26  ;;  %v1756_v37 = vcombine.high %v1746_v25, %v4397_v3 }
 0x17f   : > { %v1166_v49 = vsel %vm501_vm3, %v1165_v40, %v3726_v4  ;;  %v1287_v4 = vcombine.high %v4414_v12, %v3613_v48  ;;  %v741_v48 = vsel %vm509_vm9, %v740_v5, %v3894_v63  ;;  %v1716_v27 = vcombine.high %v4419_v41, %v4418_v30 }
 0x180   : > { %v3921_v17 = vpop.permute.xlu1 %1154  ;;  %1999 = vrot.lane.b32.xlu0 %v1914_v58, %s2872_s29  ;;  %v1167_v43 = vsel %vm503_vm4, %v1166_v49, %v3744_v32  ;;  %v1700_v32 = vcombine.high %v4417_v55, %v4416_v35  ;;  %v1285_v59 = vrot.slane %v1271_v42, %v3133_v29  ;;  %v2079_v55 = vcombine.low %v3626_v21, %v3642_v18  ;;  %v4426_v42 = vld [vmem:[#allocation30_spill] sm:$0xff] }
 0x181   : > { %v1168_v62 = vsel %vm505_vm5, %v1167_v43, %v3758_v47  ;;  %v1730_v30 = vrot.slane %v1716_v27, %v3133_v29  ;;  %v1973_v40 = vcombine.high %v1970_v46, %v4397_v3  ;;  %v1698_v2 = vcombine.high %v1694_v22, %v4397_v3 }
 0x182   : > { %1795 = vrot.lane.b32.xlu1 %v1746_v25, %s2868_s17  ;;  %v465_v50 = vpop.permute.xlu0 %464  ;;  %v1169_v41 = vsel %vm507_vm6, %v1168_v62, %v3772_v52  ;;  %v1714_v47 = vrot.slane %v1700_v32, %v3133_v29  ;;  %v2064_v38 = vcombine.high %v3632_v34, %v3645_v19 }
 0x183   : > { %v3935_v20 = vsel %vm507_vm6, %v506_v10, %v465_v50 }
 0x184   : > { %v1980_v51 = vpop.permute.xlu1 %1979  ;;  %1350 = vrot.lane.b32.xlu0 %v1265_v39, %s2870_s20  ;;  %v1747_v13 = vcombine.low %v1714_v47, %v1730_v30 }
 0x185   : > { %v3939_v57 = vsel %vm501_vm3, %v2026_v54, %v1980_v51 }
 0x186   : > { %2019 = vrot.lane.b32.xlu1 %v1970_v46, %s2871_s26  ;;  %v3952_v58 = vpop.permute.xlu0 %484  ;;  %v1754_v46 = vrot.slane %v1747_v13, %v3282_v1 }
 0x188   : > { %v3954_v8 = vpop.permute.xlu1 %480  ;;  %1574 = vrot.lane.b32.xlu0 %v3754_v15, %s2873_s19  ;;  %v4424_v15 = vld [vmem:[#allocation20_spill] sm:$0xff]  ;;  %v1757_v27 = vcombine.high %v1754_v46, %v4397_v3 }
 0x189   : > { %v952_v9 = vsel %vm499_vm2, %v4424_v15, %v3822_v53 }
 0x18a   : > { %1370 = vrot.lane.b32.xlu1 %v1327_v28, %s2869_s28  ;;  %v730_v36 = vpop.permute.xlu0 %729  ;;  %v953_v26 = vsel %vm501_vm3, %v952_v9, %v3790_v16  ;;  %v1301_v16 = vrot.slane %v1287_v4, %v3133_v29  ;;  %v4425_v4 = vld [vmem:[#allocation21_spill] sm:$0xff] }
 0x18b   : > { %v3985_v12 = vsel %vm521_vm10, %v746_v7, %v730_v36  ;;  %v954_v63 = vsel %vm503_vm4, %v953_v26, %v3859_v6  ;;  %v2063_v6 = vcombine.low %v3632_v34, %v3645_v19  ;;  %v1597_v15 = vsel %vm499_vm2, %v4425_v4, %v3868_v44 }
 0x18c   : > { %v710_v53 = vpop.permute.xlu1 %709  ;;  %1779 = vrot.lane.b32.xlu0 %v1694_v22, %s2870_s20  ;;  %v955_v25 = vsel %vm505_vm5, %v954_v63, %v3909_v33  ;;  %v1170_v33 = vsel %vm509_vm9, %v1169_v41, %v3902_v31  ;;  %v1318_v14 = vcombine.low %v1285_v59, %v1301_v16  ;;  %v2087_v31 = vrot.slane %v2079_v55, %v3133_v29 }
 0x18d   : > { %v3988_v10 = vsel %vm511_vm11, %v741_v48, %v710_v53  ;;  %v2071_v28 = vrot.slane %v2063_v6, %v3133_v29  ;;  %v2080_v22 = vcombine.high %v3626_v21, %v3642_v18  ;;  %v1598_v5 = vsel %vm501_vm3, %v1597_v15, %v3918_v0  ;;  %v4427_v0 = vld [vmem:[#allocation28_spill] sm:$0xff]  ;;  %v4428_v48 = vld [vmem:[#allocation31_spill] sm:$0xff]  ;;  %v4429_v53 = vld [vmem:[#allocation29_spill] sm:$0xff] }
 0x18e   : > { %1594 = vrot.lane.b32.xlu1 %v1544_v56, %s2874_s15  ;;  %v4003_v50 = vpop.permute.xlu0 %933  ;;  %v1325_v45 = vrot.slane %v1318_v14, %v3282_v1  ;;  %v2078_v34 = vrot.slane %v2064_v38, %v3133_v29  ;;  %v2147_v43 = vcombine.low %v4427_v0, %v4426_v42  ;;  %v2131_v26 = vcombine.low %v4429_v53, %v4428_v48 }
 0x18f   : > { %v2095_v56 = vcombine.low %v2071_v28, %v2087_v31  ;;  %v2094_v21 = vrot.slane %v2080_v22, %v3133_v29  ;;  %v2096_v18 = vcombine.high %v2071_v28, %v2087_v31  ;;  %v2148_v6 = vcombine.high %v4427_v0, %v4426_v42  ;;  %v4430_v28 = vld [vmem:[#allocation26_spill] sm:$0xff] }
 0x190   : > { %v918_v54 = vpop.permute.xlu1 %917  ;;  %2003 = vrot.lane.b32.xlu0 %v3770_v11, %s2873_s19  ;;  %v1269_v11 = vcombine.high %v1265_v39, %v4397_v3 }
 0x191   : > { %v4010_v35 = vsel %vm507_vm6, %v955_v25, %v918_v54  ;;  %v4061_v44 = vrot.slane %v2095_v56, %v3282_v1  ;;  %v2111_v62 = vcombine.low %v2078_v34, %v2094_v21  ;;  %v2110_v59 = vrot.slane %v2096_v18, %v3282_v1 }
 0x192   : > { %1799 = vrot.lane.b32.xlu1 %v1756_v37, %s2869_s28  ;;  %v1139_v51 = vpop.permute.xlu0 %1138  ;;  %v2155_v25 = vrot.slane %v2147_v43, %v3133_v29  ;;  %v2139_v54 = vrot.slane %v2131_v26, %v3133_v29  ;;  %v2162_v13 = vrot.slane %v2148_v6, %v3133_v29  ;;  %v2112_v38 = vcombine.high %v2078_v34, %v2094_v21 }
 0x193   : > { %v4027_v52 = vsel %vm511_vm11, %v1170_v33, %v1139_v51  ;;  %v2127_v16 = vcombine.high %v4061_v44, %v4397_v3  ;;  %v2128_v41 = vcombine.high %v2110_v59, %v4397_v3  ;;  %v2119_v47 = vrot.slane %v2111_v62, %v3282_v1 }
 0x194   : > { %v4029_v23 = vpop.permute.xlu1 %937  ;;  %1354 = vrot.lane.b32.xlu0 %v1269_v11, %s2872_s29  ;;  %v2163_v30 = vcombine.low %v2139_v54, %v2155_v25  ;;  %v2132_v33 = vcombine.high %v4429_v53, %v4428_v48  ;;  %v2164_v51 = vcombine.high %v2139_v54, %v2155_v25  ;;  %v2126_v34 = vrot.slane %v2112_v38, %v3282_v1 }
 0x195   : > { %v2129_v14 = vcombine.high %v2119_v47, %v4397_v3  ;;  %v2875_v53 = vmov 0  }
 0x196   : > { %2023 = vrot.lane.b32.xlu1 %v1973_v40, %s2874_s15  ;;  %v1331_v39 = vpop.permute.xlu0 %1330  ;;  %v2146_v31 = vrot.slane %v2132_v33, %v3133_v29  ;;  %v2178_v22 = vrot.slane %v2164_v51, %v3282_v1  ;;  %2717 = vset.pattern.permute.xlu0 %v2875_v53  ;;  %v2130_v26 = vcombine.high %v2126_v34, %v4397_v3 }
 0x197   : > { %2716 = vset.pattern.permute.xlu1 %v2875_v53 }
 0x198   : > { %v4037_v49 = vpop.permute.xlu1 %1158  ;;  %1783 = vrot.lane.b32.xlu0 %v1698_v2, %s2872_s29  ;;  %v2171_v2 = vrot.slane %v2163_v30, %v3282_v1 }
 0x19a   : > { %1374 = vrot.lane.b32.xlu1 %v1325_v45, %s2871_s26  ;;  %v1760_v9 = vpop.permute.xlu0 %1759  ;;  %v2187_v15 = vcombine.high %v2171_v2, %v4397_v3 }
 0x19c   : > { %v1555_v7 = vpop.permute.xlu1 %1554  ;;  %1358 = vrot.lane.b32.xlu0 %v3875_v60, %s2873_s19  ;;  %v1328_v60 = vcombine.high %v1325_v45, %v4397_v3  ;;  %v1381_v45 = vsel %vm499_vm2, %v4430_v28, %v1331_v39  ;;  %v2188_v39 = vcombine.high %v2178_v22, %v4397_v3 }
 0x19d   : > { %v1599_v36 = vsel %vm503_vm4, %v1598_v5, %v1555_v7  ;;  %v2179_v5 = vcombine.low %v2146_v31, %v2162_v13  ;;  %v4431_v7 = vld [vmem:[#allocation27_spill] sm:$0xff] }
 0x19e   : > { %1803 = vrot.lane.b32.xlu1 %v1754_v46, %s2871_s26  ;;  %v4058_v19 = vpop.permute.xlu0 %468  ;;  %v1810_v29 = vsel %vm499_vm2, %v4431_v7, %v1760_v9 }
 0x19f   : > { %v2186_v48 = vrot.slane %v2179_v5, %v3282_v1  ;;  %v310_v1 = vld [vmem:[%s4342_s4] sm:$0xff]  ;;  %v510_v31 = vsel %vm509_vm9, %v3935_v20, %v4058_v19  ;;  %v518_v5 = vsel %vm517_vm7, %v3954_v8, %v3952_v58 }
 0x1a0   : > { %v1984_v37 = vpop.permute.xlu1 %1983  ;;  %1787 = vrot.lane.b32.xlu0 %v3884_v24, %s2873_s19 }
 0x1a1   : > { %v2028_v32 = vsel %vm503_vm4, %v3939_v57, %v1984_v37 }
 0x1a2   : > { %1378 = vrot.lane.b32.xlu1 %v1328_v60, %s2874_s15  ;;  %v4074_v63 = vpop.permute.xlu0 %713  ;;  %v2189_v60 = vcombine.high %v2186_v48, %v4397_v3 }
 0x1a3   : > { %v743_v33 = vsel %vm513_vm12, %v3988_v10, %v4074_v63 }
 0x1a4   : > { %v4081_v57 = vpop.permute.xlu1 %488  ;;  %2191 = vrot.lane.b32.xlu0 %v2127_v16, %s2863_s16 }
 0x1a6   : > { %1807 = vrot.lane.b32.xlu1 %v1757_v27, %s2874_s15  ;;  %v4085_v24 = vpop.permute.xlu0 %921 }
 0x1a8   : > { %v4089_v55 = vpop.permute.xlu1 %733  ;;  %2199 = vrot.lane.b32.xlu0 %v2128_v41, %s2865_s14 }
 0x1a9   : > { %v748_v20 = vsel %vm523_vm14, %v3985_v12, %v4089_v55  ;;  %v957_v12 = vsel %vm509_vm9, %v4010_v35, %v4085_v24 }
 0x1aa   : > { %2195 = vrot.lane.b32.xlu1 %v2110_v59, %s2864_s7  ;;  %v4097_v11 = vpop.permute.xlu0 %1142 }
 0x1ab   : > { %v1172_v28 = vsel %vm513_vm12, %v4027_v52, %v4097_v11 }
 0x1ac   : > { %v4100_v40 = vpop.permute.xlu1 %941  ;;  %2207 = vrot.lane.b32.xlu0 %v2129_v14, %s2867_s13 }
 0x1ae   : > { %2203 = vrot.lane.b32.xlu1 %v2119_v47, %s2866_s11  ;;  %v1335_v46 = vpop.permute.xlu0 %1334 }
 0x1af   : > { %v1382_v56 = vsel %vm501_vm3, %v1381_v45, %v1335_v46  ;;  %v4432_v45 = vld [vmem:[#allocation33_spill] sm:$0xff]  ;;  %v4433_v46 = vld [vmem:[#allocation32_spill] sm:$0xff] }
 0x1b0   : > { %v4111_v4 = vpop.permute.xlu1 %1162  ;;  %2227 = vrot.lane.b32.xlu0 %v2178_v22, %s2868_s17  ;;  %v1173_v19 = vsel %vm515_vm13, %v1172_v28, %v4433_v46 }
 0x1b2   : > { %2223 = vrot.lane.b32.xlu1 %v2187_v15, %s2861_s8  ;;  %v1764_v18 = vpop.permute.xlu0 %1763 }
 0x1b3   : > { %v1811_v42 = vsel %vm501_vm3, %v1810_v29, %v1764_v18  ;;  %v520_v29 = vsel %vm519_vm8, %v518_v5, %v4081_v57  ;;  %v961_v57 = vsel %vm517_vm7, %v4003_v50, %v4029_v23 }
 0x1b4   : > { %v1559_v21 = vpop.permute.xlu1 %1558  ;;  %2231 = vrot.lane.b32.xlu0 %v2188_v39, %s2869_s28 }
 0x1b5   : > { %v1600_v0 = vsel %vm505_vm5, %v1599_v36, %v1559_v21 }
 0x1b6   : > { %2211 = vrot.lane.b32.xlu1 %v2126_v34, %s2870_s20  ;;  %v473_v43 = vpop.permute.xlu0 %472  ;;  %s2628_s20 = sshll.u32 %s2933_s25, 8  ;;  %s2495_s25 = scalar_lea.sflag [#allocation4], %s3052_s18 }
 0x1b7   : > { %v512_v10 = vsel %vm511_vm11, %v510_v31, %v473_v43  ;;  %v962_v43 = vsel %vm519_vm8, %v961_v57, %v4100_v40 }
 0x1b8   : > { %v1988_v9 = vpop.permute.xlu1 %1987  ;;  %2235 = vrot.lane.b32.xlu0 %v2186_v48, %s2871_s26  ;;  %s307_s26 = scalar_lea.vmem [#allocation7], %s2613_s0  ;;  %s2876_s0 = smov [#allocation7]  }
 0x1b9   : > { %v2029_v37 = vsel %vm505_vm5, %v2028_v32, %v1988_v9  ;;  %v311_v32 = vld [vmem:[%s4343_s5] sm:$0xff]  ;;  %s2786_s16 = sshll.u32 %s2876_s0, 4  ;;  %s2787_s16 = int_to_ptr.vmem [resolvable:$false] %s2786_s16 }
 0x1ba   : > { %2215 = vrot.lane.b32.xlu1 %v2130_v26, %s2872_s29  ;;  %v926_v36 = vpop.permute.xlu0 %925  ;;  %s2509_s29 = sshll.u32 %s307_s26, 4  ;;  %s2788_s7 = scalar_lea.vmem %s2787_s16, 512  ;;  %s4296_s29 = int_to_ptr.vmem [resolvable:$true] %s2509_s29 }
 0x1bb   : > { %v958_v18 = vsel %vm511_vm11, %v957_v12, %v926_v36  ;;  %s2782_s8 = scalar_lea.vmem %s4296_s29, 256  ;;  %p2789_p5 = scmp.lt.s32.totalorder %s4296_s29, %s2787_s16 }
 0x1bc   : > { %v493_v27 = vpop.permute.xlu1 %492  ;;  %2239 = vrot.lane.b32.xlu0 %v2189_v60, %s2874_s15  ;;  %p2783_p6 = scmp.ne.s32.totalorder %s4296_s29, %s2782_s8  ;;  %p2790_p7 = scmp.lt.s32.totalorder %s2788_s7, %s2782_s8 }
 0x1bd   : > { %v522_v21 = vsel %vm521_vm10, %v520_v29, %v493_v27 }
 0x1be   : > { %2219 = vrot.lane.b32.xlu1 %v2171_v2, %s2873_s19  ;;  %v1339_v62 = vpop.permute.xlu0 %1338  ;;  %v744_v2 = vsel %vm515_vm13, %v743_v33, %v3840_v61  ;;  %v1174_v61 = vsel %vm517_vm7, %v4433_v46, %v4432_v45  ;;  %p2784_p11 = pnand %p2783_p6, %p4434_p13  ;;  %p2791_p9 = por %p2790_p7, %p2789_p5 }
 0x1bf   : > { %v4139_v16 = vsel %vm503_vm4, %v1382_v56, %v1339_v62  ;;  %v2257_v22 = vrot.slane %v744_v2, 4  ;;  %v1175_v15 = vsel %vm519_vm8, %v1174_v61, %v3921_v17  ;;  %v2258_v17 = vrot.slane %v748_v20, 4 }
 0x1c0   : > { %v946_v59 = vpop.permute.xlu1 %945  ;;  %2290 = vperm.xlu0 %2717, %v310_v1   ;;  %v1176_v7 = vsel %vm521_vm10, %v1175_v15, %v4037_v49  ;;  %p2785_p4 = pneg %p2784_p11 }
 0x1c1   : > { %v1177_v35 = vsel %vm523_vm14, %v1176_v7, %v4111_v4 }
 0x1c2   : > { %2386 = vperm.xlu1 %2716, %v311_v32   ;;  %v4141_v3 = vpop.permute.xlu0 %1578  ;;  %v2264_v26 = vrot.slane %v1177_v35, 4  ;;  %p2792_p3 = pnand %p2791_p9, %p2785_p4 }
 0x1c4   : > { %v1563_v25 = vpop.permute.xlu1 %1562 }
 0x1c5   : > { %v4144_v54 = vsel %vm507_vm6, %v1600_v0, %v1563_v25 }
 0x1c6   : > { %v1768_v41 = vpop.permute.xlu0 %1767 }
 0x1c7   : > { %v4147_v47 = vsel %vm503_vm4, %v1811_v42, %v1768_v41  ;;  %v2263_v42 = vrot.slane %v1173_v19, 4 }
 0x1c8   : > { %v1583_v30 = vpop.permute.xlu1 %1582 }
 0x1c9   : > { %v4151_v6 = vsel %vm517_vm7, %v4141_v3, %v1583_v30 }
 0x1ca   : > { %v4156_v51 = vpop.permute.xlu0 %2007 }
 0x1cc   : > { %v1992_v14 = vpop.permute.xlu1 %1991 }
 0x1cd   : > { %v4161_v13 = vsel %vm507_vm6, %v2029_v37, %v1992_v14  ;;  %v963_v37 = vsel %vm521_vm10, %v962_v43, %v946_v59 }
 0x1ce   : > { %v477_v63 = vpop.permute.xlu0 %476 }
 0x1cf   : > { %v514_v38 = vsel %vm513_vm12, %v512_v10, %v477_v63 }
 0x1d0   : > { %v2012_v56 = vpop.permute.xlu1 %2011  ;;  %v516_v52 = vsel %vm515_vm13, %v514_v38, %v3954_v8 }
 0x1d1   : > { %v4183_v11 = vsel %vm517_vm7, %v4156_v51, %v2012_v56  ;;  %v2280_v55 = vsel %vm2279_vm15, %v516_v52, %v2257_v22 }
 0x1d2   : > { %v930_v39 = vpop.permute.xlu0 %929  ;;  %v2374_v9 = vmul.f32 %v2280_v55, %v2280_v55 }
 0x1d3   : > { %v959_v58 = vsel %vm513_vm12, %v958_v18, %v930_v39 }
 0x1d4   : > { %v497_v8 = vpop.permute.xlu1 %496  ;;  %v960_v24 = vsel %vm515_vm13, %v959_v58, %v4003_v50 }
 0x1d5   : > { %v524_v49 = vsel %vm523_vm14, %v522_v21, %v497_v8  ;;  %v2282_v0 = vsel %vm2279_vm15, %v960_v24, %v2263_v42 }
 0x1d6   : > { %v2281_v34 = vsel %vm2279_vm15, %v524_v49, %v2258_v17  ;;  %v1343_v48 = vpop.permute.xlu0 %1342  ;;  %v2631_v53 = vpack.c.bf16 %v2282_v0, %v2280_v55  ;;  %v2376_v4 = vmul.f32 %v2282_v0, %v2282_v0 }
 0x1d7   : > { %v2375_v62 = vmul.f32 %v2281_v34, %v2281_v34 }
 0x1d8   : > { %v950_v36 = vpop.permute.xlu1 %949  ;;  %v2639_v27 = vpack.c.bf16 %v2376_v4, %v2374_v9 }
 0x1d9   : > { %v964_v60 = vsel %vm523_vm14, %v963_v37, %v950_v36 }
 0x1da   : > { %v2283_v50 = vsel %vm2279_vm15, %v964_v60, %v2264_v26  ;;  %v1587_v23 = vpop.permute.xlu0 %1586 }
 0x1db   : > { %v2629_v1 = vpack.c.bf16 %v2283_v50, %v2281_v34  ;;  %v2377_v32 = vmul.f32 %v2283_v50, %v2283_v50  ;;  %v1607_v0 = vsel %vm519_vm8, %v4151_v6, %v1587_v23 }
 0x1dc   : > { %v1567_v25 = vpop.permute.xlu1 %1566 }
 0x1dd   : > { %2630 = vmatprep.subr.bf16.mxu0 %v2629_v1  ;;  %v2637_v40 = vpack.c.bf16 %v2377_v32, %v2375_v62  ;;  %v1602_v38 = vsel %vm509_vm9, %v4144_v54, %v1567_v25 }
 0x1de   : > { %2632 = vmatpush1.bf16.msra.mxu0 %v2631_v53  ;;  %v1996_v41 = vpop.permute.xlu0 %1995 }
 0x1df   : > { %2638 = vmatprep.subr.bf16.mxu1 %v2637_v40  ;;  %v2031_v55 = vsel %vm509_vm9, %v4161_v13, %v1996_v41 }
 0x1e0   : > { %v1772_v30 = vpop.permute.xlu1 %1771  ;;  %2640 = vmatpush1.bf16.msra.mxu1 %v2639_v27 }
 0x1e1   : > { %v1813_v49 = vsel %vm505_vm5, %v4147_v47, %v1772_v30 }
 0x1e2   : > { %v1347_v33 = vpop.permute.xlu0 %1346 }
 0x1e4   : > { %v2016_v59 = vpop.permute.xlu1 %2015 }
 0x1e5   : > { %v2036_v47 = vsel %vm519_vm8, %v4183_v11, %v2016_v59 }
 0x1e6   : > { %v1367_v14 = vpop.permute.xlu0 %1366 }
 0x1e8   : > { %v1363_v2 = vpop.permute.xlu1 %1362 }
 0x1ea   : > { %v1591_v31 = vpop.permute.xlu0 %1590 }
 0x1eb   : > { %v1608_v53 = vsel %vm521_vm10, %v1607_v0, %v1591_v31  ;;  %v308_v0 = vld [vmem:[%s4340_s2] sm:$0xff] }
 0x1ec   : > { %v1571_v28 = vpop.permute.xlu1 %1570 }
 0x1ed   : > { %v1603_v56 = vsel %vm511_vm11, %v1602_v38, %v1571_v28 }
 0x1ee   : > { %v1792_v10 = vpop.permute.xlu0 %1791 }
 0x1f0   : > { %v1776_v63 = vpop.permute.xlu1 %1775 }
 0x1f2   : > { %v2000_v45 = vpop.permute.xlu0 %1999 }
 0x1f3   : > { %v2032_v7 = vsel %vm511_vm11, %v2031_v55, %v2000_v45 }
 0x1f4   : > { %v1796_v46 = vpop.permute.xlu1 %1795 }
 0x1f5   : > { %v1819_v25 = vsel %vm517_vm7, %v1792_v10, %v1796_v46 }
 0x1f6   : > { %v1351_v61 = vpop.permute.xlu0 %1350 }
 0x1f8   : > { %v2020_v22 = vpop.permute.xlu1 %2019 }
 0x1f9   : > { %v2037_v60 = vsel %vm521_vm10, %v2036_v47, %v2020_v22 }
 0x1fa   : > { %v1575_v20 = vpop.permute.xlu0 %1574 }
 0x1fb   : > { %v1604_v19 = vsel %vm513_vm12, %v1603_v56, %v1575_v20 }
 0x1fc   : > { %v1371_v52 = vpop.permute.xlu1 %1370  ;;  %v1605_v15 = vsel %vm515_vm13, %v1604_v19, %v4141_v3  ;;  %v1384_v3 = vsel %vm505_vm5, %v4139_v16, %v1343_v48  ;;  %v1814_v16 = vsel %vm507_vm6, %v1813_v49, %v1776_v63  ;;  %v1390_v48 = vsel %vm517_vm7, %v1363_v2, %v1367_v14 }
 0x1fd   : > { %v1385_v8 = vsel %vm507_vm6, %v1384_v3, %v1347_v33  ;;  %v2269_v57 = vrot.slane %v1605_v15, 4  ;;  %v1391_v26 = vsel %vm519_vm8, %v1390_v48, %v1371_v52  ;;  %v309_v48 = vld [vmem:[%s4341_s3] sm:$0xff] }
 0x1fe   : > { %v1780_v5 = vpop.permute.xlu0 %1779  ;;  %v1386_v13 = vsel %vm509_vm9, %v1385_v8, %v1351_v61 }
 0x1ff   : > { %v1815_v9 = vsel %vm509_vm9, %v1814_v16, %v1780_v5 }
 0x200   : > { %v1595_v12 = vpop.permute.xlu1 %1594 }
 0x201   : > { %v1609_v37 = vsel %vm523_vm14, %v1608_v53, %v1595_v12 }
 0x202   : > { %v2004_v29 = vpop.permute.xlu0 %2003  ;;  %v2270_v40 = vrot.slane %v1609_v37, 4 }
 0x203   : > { %v2033_v18 = vsel %vm513_vm12, %v2032_v7, %v2004_v29 }
 0x204   : > { %v1800_v54 = vpop.permute.xlu1 %1799  ;;  %v2034_v39 = vsel %vm515_vm13, %v2033_v18, %v4156_v51 }
 0x205   : > { %v2275_v27 = vrot.slane %v2034_v39, 4  ;;  %v1820_v30 = vsel %vm519_vm8, %v1819_v25, %v1800_v54 }
 0x206   : > { %v1355_v17 = vpop.permute.xlu0 %1354 }
 0x207   : > { %v1387_v35 = vsel %vm511_vm11, %v1386_v13, %v1355_v17 }
 0x208   : > { %v2024_v42 = vpop.permute.xlu1 %2023 }
 0x209   : > { %v2038_v62 = vsel %vm523_vm14, %v2037_v60, %v2024_v42 }
 0x20a   : > { %v1784_v21 = vpop.permute.xlu0 %1783  ;;  %v2276_v31 = vrot.slane %v2038_v62, 4  ;;  %v2485_v62 = vld [vmem:[%s3064_s12] sm:$0xff] }
 0x20b   : > { %v1816_v6 = vsel %vm511_vm11, %v1815_v9, %v1784_v21 }
 0x20c   : > { %v1375_v58 = vpop.permute.xlu1 %1374 }
 0x20d   : > { %v1392_v50 = vsel %vm521_vm10, %v1391_v26, %v1375_v58 }
 0x20e   : > { %v1359_v24 = vpop.permute.xlu0 %1358 }
 0x20f   : > { %v1388_v51 = vsel %vm513_vm12, %v1387_v35, %v1359_v24 }
 0x210   : > { %v1804_v34 = vpop.permute.xlu1 %1803  ;;  %v1389_v43 = vsel %vm515_vm13, %v1388_v51, %v1363_v2 }
 0x211   : > { %v2284_v4 = vsel %vm2279_vm15, %v1389_v43, %v2269_v57  ;;  %v1821_v28 = vsel %vm521_vm10, %v1820_v30, %v1804_v34  ;;  %v2486_v30 = vld [vmem:[%s3064_s12 + $0x8] sm:$0xff]  ;;  %s4294_s12 = scalar_lea.hbm %s4344_s6, %s2628_s20 }
 0x212   : > { %v1788_v36 = vpop.permute.xlu0 %1787  ;;  %v2378_v14 = vmul.f32 %v2284_v4, %v2284_v4 }
 0x213   : > { %v1817_v23 = vsel %vm513_vm12, %v1816_v6, %v1788_v36 }
 0x214   : > { %v1379_v1 = vpop.permute.xlu1 %1378  ;;  %v1818_v32 = vsel %vm515_vm13, %v1817_v23, %v1792_v10 }
 0x215   : > { %v1393_v11 = vsel %vm523_vm14, %v1392_v50, %v1379_v1  ;;  %v2286_v41 = vsel %vm2279_vm15, %v1818_v32, %v2275_v27 }
 0x216   : > { %v2192_v33 = vpop.permute.xlu0 %2191  ;;  %v2635_v59 = vpack.c.bf16 %v2286_v41, %v2284_v4  ;;  %v2380_v2 = vmul.f32 %v2286_v41, %v2286_v41  ;;  %v2285_v63 = vsel %vm2279_vm15, %v1393_v11, %v2270_v40 }
 0x217   : > { %v2379_v46 = vmul.f32 %v2285_v63, %v2285_v63  ;;  %v2242_v7 = vsel %vm499_vm2, %v4061_v44, %v2192_v33 }
 0x218   : > { %v1808_v45 = vpop.permute.xlu1 %1807  ;;  %v2643_v22 = vpack.c.bf16 %v2380_v2, %v2378_v14 }
 0x219   : > { %v1822_v61 = vsel %vm523_vm14, %v1821_v28, %v1808_v45 }
 0x21a   : > { %v2287_v10 = vsel %vm2279_vm15, %v1822_v61, %v2276_v31  ;;  %v2200_v56 = vpop.permute.xlu0 %2199 }
 0x21b   : > { %v2381_v38 = vmul.f32 %v2287_v10, %v2287_v10  ;;  %v2633_v20 = vpack.c.bf16 %v2287_v10, %v2285_v63 }
 0x21c   : > { %v2196_v19 = vpop.permute.xlu1 %2195 }
 0x21d   : > { %2634 = vmatprep.subr.bf16.mxu0 %v2633_v20  ;;  %v2641_v52 = vpack.c.bf16 %v2381_v38, %v2379_v46  ;;  %v2243_v29 = vsel %vm501_vm3, %v2242_v7, %v2196_v19 }
 0x21e   : > { %2636 = vmatpush1.bf16.msra.mxu0 %v2635_v59  ;;  %v2208_v15 = vpop.permute.xlu0 %2207  ;;  %v2244_v39 = vsel %vm503_vm4, %v2243_v29, %v2200_v56 }
 0x21f   : > { %2642 = vmatprep.subr.bf16.mxu1 %v2641_v52 }
 0x220   : > { %v2204_v5 = vpop.permute.xlu1 %2203  ;;  %2644 = vmatpush1.bf16.msra.mxu1 %v2643_v22 }
 0x221   : > { %v2245_v17 = vsel %vm505_vm5, %v2244_v39, %v2204_v5  ;;  %vm2492_vm5 = vcmask 556032  }
 0x222   : > { %v2228_v12 = vpop.permute.xlu0 %2227  ;;  %v2246_v8 = vsel %vm507_vm6, %v2245_v17, %v2208_v15 }
 0x224   : > { %v2224_v55 = vpop.permute.xlu1 %2223 }
 0x225   : > { %v2251_v42 = vsel %vm517_vm7, %v2224_v55, %v2228_v12 }
 0x226   : > { %v2232_v18 = vpop.permute.xlu0 %2231 }
 0x227   : > { %v2252_v58 = vsel %vm519_vm8, %v2251_v42, %v2232_v18 }
 0x228   : > { %v2212_v54 = vpop.permute.xlu1 %2211 }
 0x229   : > { %v2247_v13 = vsel %vm509_vm9, %v2246_v8, %v2212_v54 }
 0x22a   : > { %v2236_v21 = vpop.permute.xlu0 %2235 }
 0x22b   : > { %v2253_v44 = vsel %vm521_vm10, %v2252_v58, %v2236_v21 }
 0x22c   : > { %v2216_v3 = vpop.permute.xlu1 %2215 }
 0x22d   : > { %v2248_v24 = vsel %vm511_vm11, %v2247_v13, %v2216_v3 }
 0x22e   : > { %v2240_v35 = vpop.permute.xlu0 %2239 }
 0x22f   : > { %v2254_v49 = vsel %vm523_vm14, %v2253_v44, %v2240_v35 }
 0x230   : > { %v2220_v57 = vpop.permute.xlu1 %2219  ;;  %v2383_v51 = vmul.f32 %v2254_v49, %v2254_v49  ;;  %2615 = vmatprep.subr.msk.mxu0 %vm2279_vm15, %v2254_v49 }
 0x231   : > { %v2249_v34 = vsel %vm513_vm12, %v2248_v24, %v2220_v57 }
 0x232   : > { %v2250_v16 = vsel %vm515_vm13, %v2249_v34, %v2224_v55  ;;  %2618 = vmatprep.subr.msk.mxu1 %vm2279_vm15, %v2383_v51 }
 0x233   : > { %2616 = vmatpush1.msk.msra.mxu0 %vm2279_vm15, %v2250_v16  ;;  %v2382_v43 = vmul.f32 %v2250_v16, %v2250_v16 }
 0x234   : > { %2617 = vmatmul.mubr.msk.f32.vlgmr.msra.gmra.mrb[0].mxu0 %vm2293_vm0, %v308_v0 }
 0x235   : > { %2619 = vmatpush1.msk.msra.mxu1 %vm2279_vm15, %v2382_v43 }
 0x236   : > { %2620 = vmatmul.mubr.msk.f32.vlgmr.msra.gmra.mrb[0].mxu1 %vm2293_vm0, %v309_v48 }
 0x23f   : > { %v2291_v27 = vpop.permute.xlu0 %2290 }
 0x241   : > { %v2387_v53 = vpop.permute.xlu1 %2386 }
 0x307   : > { %v2369_v9 = vpop.f32.mrb[0].mxu0 }
 0x308   : > { %v2371_v4 = vpop.f32.mrb[1].mxu0  ;;  %v2370_v32 = vadd.f32 %v2369_v9, %v2291_v27 }
 0x309   : > { %v2464_v47 = vpop.f32.mrb[0].mxu1  ;;  %v2372_v59 = vadd.f32 %v2371_v4, %v2291_v27 }
 0x30a   : > { %v2465_v26 = vadd.f32 %v2464_v47, %v2387_v53  ;;  %v2466_v37 = vpop.f32.mrb[1].mxu1 }
 0x30b   : > { %v2467_v6 = vadd.f32 %v2466_v37, %v2387_v53 }
 0x30c   : > { %v2469_v36 = vmax.f32 %v2465_v26, 0.0 }
 0x30d   : > { %v2470_v60 = vmax.f32 %v2467_v6, 0.0 }
 0x30e   : > { %2718 = vrsqrt.f32 %v2469_v36  ;;  %vm2473_vm1 = vcmp.eq.f32.partialorder %v2469_v36, inf  ;;  %v2476_v11 = vand.u32 2147483648, %v2469_v36  ;;  %vm2475_vm2 = vcmp.eq.f32.partialorder %v2469_v36, 0.0 }
 0x30f   : > { %2720 = vrsqrt.f32 %v2470_v60  ;;  %vm2480_vm3 = vcmp.eq.f32.partialorder %v2470_v60, inf  ;;  %v2483_v41 = vand.u32 2147483648, %v2470_v60  ;;  %vm2482_vm4 = vcmp.eq.f32.partialorder %v2470_v60, 0.0 }
 0x318   : > { %v2719_v50 = vpop.eup %2718 }
 0x319   : > { %v2721_v23 = vpop.eup %2720  ;;  %v2472_v1 = vmul.f32 %v2719_v50, %v2469_v36 }
 0x31a   : > { %v2479_v25 = vmul.f32 %v2721_v23, %v2470_v60 }
 0x31b   : > { %v2474_v40 = vsel %vm2473_vm1, %v2469_v36, %v2472_v1 }
 0x31c   : > { %v2477_v33 = vsel %vm2475_vm2, %v2476_v11, %v2474_v40  ;;  %v2481_v14 = vsel %vm2480_vm3, %v2470_v60, %v2479_v25 }
 0x31d   : > { %v2487_v2 = vmul.f32 %v2485_v62, %v2477_v33  ;;  %v2484_v31 = vsel %vm2482_vm4, %v2483_v41, %v2481_v14 }
 0x31e   : > { %v2488_v28 = vmul.f32 %v2486_v30, %v2484_v31 }
 0x31f   : > { %v2489_v63 = vadd.f32 %v2487_v2, %v2370_v32 }
 0x320   : > { %v2490_v45 = vadd.f32 %v2488_v28, %v2372_v59 }
 0x321   : > { %2491 = vst [vmem:[%s307_s26] sm:$0xff] %v2489_v63 }
 0x322   : > { %2493 = vst.msk [vmem:[%s307_s26 + $0x8] sm:$0xff] %vm2492_vm5, %v2490_v45 }
 0x323   : > { %2795 = shalt.err (!%p2792_p3)
}
 0x324   : > { %s2796_s18 = scalar_lea.hbm %s4294_s12, 256  ;;  %s2800_s13 = scalar_lea.hbm %s4344_s6, 512 }
 0x325   : > { %p2797_p12 = scmp.ne.s32.totalorder %s4294_s12, %s2796_s18  ;;  %p2801_p2 = scmp.lt.u32.totalorder %s4294_s12, %s4344_s6 }
 0x326   : > { %p2802_p10 = scmp.lt.u32.totalorder %s2800_s13, %s2796_s18  ;;  %p2804_p6 = scmp.lt.u32.totalorder %s2796_s18, %s4294_s12 }
 0x327   : > { %p2798_p8 = pnand %p2797_p12, %p4434_p13 }
 0x328   : > { %p2803_p1 = por %p2802_p10, %p2801_p2 }
 0x329   : > { %p2799_p0 = pneg %p2798_p8 }
 0x32a   : > { %p2805_p11 = por %p2804_p6, %p2803_p1 }
 0x32c   : > { %p2806_p4 = pnand %p2805_p11, %p2799_p0 }
 0x32e   : > { %2809 = shalt.err (!%p2806_p4)
}
 0x32f   : > { %2649 = dma.vmem_to_hbm [thread:$0]  (%p4434_p13), %s4296_s29, 256, %s4294_s12, %s2495_s25  }
 0x330 PF: > { %s2521_s20 = sand.u32 1, %s2840_s21   ;;  %p4435_p5 = scmp.ne.s32.totalorder %s4379_s10, 0 }
 0x331   : > { %p4436_p7 = scmp.ge.s32.totalorder %s2852_s24, 2  ;;  %s2522_s26 = scalar_lea.sflag [#allocation4], %s2521_s20 }
 0x333   : > { %p2659_p9 = pnand %p4436_p7, %p4435_p5 }
 0x335   : > { %2835 = dma.done.wait (!%p2659_p9), %s2522_s26, 256  }
 0x336   : > { %2837 = vsyncadd (!%p2659_p9), %s2522_s26, 4294967040  ;;  %p22_p3 = scmp.ge.s32.totalorder %s2937_s27, 4   ;;  %s4437_s21 = smov %s2844_s22 }
 0x337   : > { %s4438_s22 = smov %s2848_s23  ;;  %s4439_s23 = smov %s2949_s30 }
 0x338   : > { %s4440_s24 = smov %s2937_s27  ;;  %24 = sbr.rel (!%p22_p3) target bundleno = 9 (0x9), region = 102 }
 0x33f   :  { %2527 = vsyncpa [#allocation3], 1 }
 0x340   :  { %2529 = vsyncpa [#allocation3 + $0x1], 1 }
 0x341   :  { %2530 = vsyncpa [#allocation6], 1 }
 0x342   :  { %2532 = vsyncpa [#allocation6 + $0x1], 1 }
 0x343   :  { %2533 = vsyncpa [#allocation4], 1 }
 0x344   :  { %2535 = vsyncpa [#allocation4 + $0x1], 1 }

</bundles_post_ra>
